<compile_context>
chip_gen: v6e
topology: v6e:2x2x1
jax: 0.10.0
libtpu: 0.0.40
codegen_flags: <defaults>
</compile_context>

<pallas_src>
import numpy as np
import jax
import jax.numpy as jnp
from jax.experimental import pallas as pl
from jax.experimental.pallas import tpu as pltpu

# ---------------- synthetic config (mirrors config.* in the PyTorch code) ----------
VOCAB_SIZE = 26
NUM_ION = 8
NUM_UNITS = 32              # config.num_units
EMBEDDING_SIZE = 32         # config.embedding_size
LSTM_HIDDEN = 32            # config.lstm_hidden_units
NUM_LSTM_LAYERS = 1         # config.num_lstm_layers
DROPOUT_RATE = 0.25         # inference -> identity
DISTANCE_SCALE_FACTOR = 10.0
BN_EPS = 1e-5
C_IN = VOCAB_SIZE * NUM_ION + 1     # 209 input channels to the T-Net
VI = C_IN - 1                       # 208 exp-distance channels
V_PAD = 32                          # vocab rounded up to the bf16 sublane tile


def _relu(x):
    return jnp.maximum(x, 0.0)


# -------------------- packed weight slab layout (static, module-level) -------------
# bf16 matrix slab: 128 lanes wide, every row offset / row count is a multiple of 16
# (the bf16 sublane tile), so every static slice is tile aligned.
_MAT_LAYOUT = (
    ('A1aT',        VI,              NUM_UNITS),          # 208 x 32
    ('A2T',         NUM_UNITS,       2 * NUM_UNITS),      # 32  x 64
    ('A3T',         2 * NUM_UNITS,   4 * NUM_UNITS),      # 64  x 128
    ('A4T',         4 * NUM_UNITS,   2 * NUM_UNITS),      # 128 x 64
    ('A5T',         2 * NUM_UNITS,   NUM_UNITS),          # 64  x 32
    ('emb_wih',     V_PAD,           4 * LSTM_HIDDEN),    # 32  x 128 (rows 26.. zero)
    ('w_hh',        LSTM_HIDDEN,     4 * LSTM_HIDDEN),    # 32  x 128
    ('w_head_ion',  NUM_UNITS,       VOCAB_SIZE),         # 32  x 26
    ('w_head_lstm', LSTM_HIDDEN,     VOCAB_SIZE),         # 32  x 26
)
_MAT_OFFSETS = {}
_off = 0
for _name, _r, _c in _MAT_LAYOUT:
    _MAT_OFFSETS[_name] = (_off, _r, _c)
    _off += _r
MAT_SLAB_ROWS = _off            # 624

# f32 bias slab: one row per bias vector, 128 lanes (padded with zeros).
_BIAS_ROW = dict(a1b=0, c1=1, c2=2, c3=3, c4=4, c5=5, b_all=6, b_head=7)


def _mat(wm_ref, name):
    off, r, c = _MAT_OFFSETS[name]
    return wm_ref[off:off + r, 0:c]


def _bias_row(bias_ref, name, width):
    r = _BIAS_ROW[name]
    return bias_ref[r:r + 1, 0:width]


# ====================== fused Pallas kernel ======================

def _fused_kernel(aa_sm, loc_ref, ploc_ref, pint_ref, h0_ref, c0_ref,
                  wm_ref, bias_ref,
                  logits_ref, hT_ref, cT_ref):
    # aa_sm:    [B, T] int32 in SMEM (scalar prefetch)
    # loc_ref:  [1, T, VI]  theoretical ion locations for every decode step t
    # ploc_ref: [1, N, 1]   observed peak locations
    # pint_ref: [1, N, 1]   observed peak intensities
    # h0_ref / c0_ref: [1, 1, H] initial LSTM state for this batch element
    # wm_ref:   [624, 128]  bf16 packed weight slab
    # bias_ref: [8, 128]    f32 packed bias slab
    b = pl.program_id(0)
    T = loc_ref.shape[1]
    N = ploc_ref.shape[1]
    U, H, V = NUM_UNITS, LSTM_HIDDEN, VOCAB_SIZE

    def mm(a, w_bf16):
        # bf16 MXU operands, f32 accumulation
        return jnp.dot(a.astype(jnp.bfloat16), w_bf16,
                       preferred_element_type=jnp.float32)

    # ---------------- TNet: masked exp-distance features + conv/FC stack ----------
    li = loc_ref[0]                                   # [T, VI]  f32
    pk = ploc_ref[0]                                  # [N, 1]
    it = pint_ref[0]                                  # [N, 1]
    pk_mask = pk > 1e-5                               # [N, 1]

    feat_blocks = []
    for t in range(T):                                # T is a trace-time constant
        li_t = li[t:t + 1, :]                         # [1, VI]
        d = jnp.exp(-jnp.abs((pk - li_t) * DISTANCE_SCALE_FACTOR))   # [N, VI]
        m = jnp.logical_and(pk_mask, li_t > 1e-5)                    # merged mask
        feat_blocks.append(jnp.where(m, d, 0.0))
    feat = jnp.concatenate(feat_blocks, axis=0)       # [T*N, VI]  rows = (t, n)
    it_col = jnp.concatenate([it] * T, axis=0)        # [T*N, 1]

    # conv1 (k=1): intensity channel handled separately (no in-kernel concat):
    #   [feat | it] @ A1 == feat @ A1a + it * a1b_row
    h1 = _relu(mm(feat, _mat(wm_ref, 'A1aT'))
               + it_col * _bias_row(bias_ref, 'a1b', U)
               + _bias_row(bias_ref, 'c1', U))                               # [TN, U]
    h2 = _relu(mm(h1, _mat(wm_ref, 'A2T')) + _bias_row(bias_ref, 'c2', 2 * U))
    h3 = _relu(mm(h2, _mat(wm_ref, 'A3T')) + _bias_row(bias_ref, 'c3', 4 * U))

    # max over the peak axis per decode step (sublane reductions on static slices)
    z_rows = [jnp.max(h3[t * N:(t + 1) * N, :], axis=0, keepdims=True)
              for t in range(T)]
    z = jnp.concatenate(z_rows, axis=0)                                      # [T, 4U]

    f1 = _relu(mm(z, _mat(wm_ref, 'A4T')) + _bias_row(bias_ref, 'c4', 2 * U))
    ion = _relu(mm(f1, _mat(wm_ref, 'A5T')) + _bias_row(bias_ref, 'c5', U))  # [T, U]

    # ---------------- embedding (one-hot) + hoisted LSTM input projection ---------
    # gates_x[t] = emb[aa[t]] @ W_ih + b_ih + b_hh, via onehot @ (emb @ W_ih)
    emb_wih = _mat(wm_ref, 'emb_wih')                 # [V_PAD, 4H] bf16
    lane_ids = jax.lax.broadcasted_iota(jnp.int32, (1, V_PAD), 1)
    oh_rows = [(lane_ids == aa_sm[b, t]).astype(jnp.float32) for t in range(T)]
    onehot = jnp.concatenate(oh_rows, axis=0)         # [T, V_PAD]
    gates_x = mm(onehot, emb_wih) + _bias_row(bias_ref, 'b_all', 4 * H)      # [T, 4H]

    # ---------------- LSTM recurrence (fully unrolled in-kernel) -----------------
    w_hh = _mat(wm_ref, 'w_hh')                       # [H, 4H] bf16
    h = h0_ref[0]                                     # [1, H]
    c = c0_ref[0]                                     # [1, H]
    hr_rows = []
    for t in range(T):
        g = gates_x[t:t + 1, :] + mm(h, w_hh)         # [1, 4H]  gate order i, f, g, o
        i_g = jax.nn.sigmoid(g[:, 0 * H:1 * H])
        f_g = jax.nn.sigmoid(g[:, 1 * H:2 * H])
        g_g = jnp.tanh(g[:, 2 * H:3 * H])
        o_g = jax.nn.sigmoid(g[:, 3 * H:4 * H])
        c = f_g * c + i_g * g_g
        h = o_g * jnp.tanh(c)
        hr_rows.append(_relu(h))                      # activation_func(lstm output)
    hr = jnp.concatenate(hr_rows, axis=0)             # [T, H]

    # ---------------- output head: split matmul (dropout = identity) -------------
    logits = (mm(ion, _mat(wm_ref, 'w_head_ion'))
              + mm(hr, _mat(wm_ref, 'w_head_lstm'))
              + _bias_row(bias_ref, 'b_head', V))     # [T, V]

    logits_ref[0] = logits
    hT_ref[0] = h
    cT_ref[0] = c


# ====================== pallas_call wrapper ======================

def fused_forward_pallas(kp, loc, ploc, pint, aa, h0b, c0b):
    B, T, nvi = loc.shape
    N = ploc.shape[1]
    H, V = LSTM_HIDDEN, VOCAB_SIZE

    grid_spec = pltpu.PrefetchScalarGridSpec(
        num_scalar_prefetch=1,
        grid=(B,),
        in_specs=[
            pl.BlockSpec((1, T, nvi), lambda b, aa_r: (b, 0, 0)),        # location_index
            pl.BlockSpec((1, N, 1), lambda b, aa_r: (b, 0, 0)),          # peaks_location
            pl.BlockSpec((1, N, 1), lambda b, aa_r: (b, 0, 0)),          # peaks_intensity
            pl.BlockSpec((1, 1, H), lambda b, aa_r: (b, 0, 0)),          # h0
            pl.BlockSpec((1, 1, H), lambda b, aa_r: (b, 0, 0)),          # c0
            pl.BlockSpec((MAT_SLAB_ROWS, 128), lambda b, aa_r: (0, 0)),  # weight slab
            pl.BlockSpec((8, 128), lambda b, aa_r: (0, 0)),              # bias slab
        ],
        out_specs=(
            pl.BlockSpec((1, T, V), lambda b, aa_r: (b, 0, 0)),          # logits
            pl.BlockSpec((1, 1, H), lambda b, aa_r: (b, 0, 0)),          # h_T
            pl.BlockSpec((1, 1, H), lambda b, aa_r: (b, 0, 0)),          # c_T
        ),
    )
    out_shape = (jax.ShapeDtypeStruct((B, T, V), jnp.float32),
                 jax.ShapeDtypeStruct((B, 1, H), jnp.float32),
                 jax.ShapeDtypeStruct((B, 1, H), jnp.float32))
    return pl.pallas_call(
        _fused_kernel,
        grid_spec=grid_spec,
        out_shape=out_shape,
        compiler_params=pltpu.CompilerParams(dimension_semantics=("parallel",)),
    )(aa, loc, ploc, pint, h0b, c0b, kp['wm'], kp['bias'])


# ====================== full model forward ======================

def forward(kp, location_index, peaks_location, peaks_intensity, aa_input, state_tuple=None):
    assert aa_input is not None
    B, T, Vv, Iv = location_index.shape
    N = peaks_location.shape[1]
    H = LSTM_HIDDEN

    loc = location_index.astype(jnp.float32).reshape(B, T, Vv * Iv)
    ploc = peaks_location.astype(jnp.float32).reshape(B, N, 1)
    pint = peaks_intensity.astype(jnp.float32).reshape(B, N, 1)

    if state_tuple is None:
        h0b = jnp.zeros((B, NUM_LSTM_LAYERS, H), jnp.float32)
        c0b = jnp.zeros((B, NUM_LSTM_LAYERS, H), jnp.float32)
    else:
        h0, c0 = state_tuple                      # [num_layers=1, B, H]
        h0b = jnp.transpose(h0, (1, 0, 2))
        c0b = jnp.transpose(c0, (1, 0, 2))

    logits, hTb, cTb = fused_forward_pallas(
        kp, loc, ploc, pint, aa_input.astype(jnp.int32), h0b, c0b)
    hT = jnp.transpose(hTb, (1, 0, 2))            # [1, B, H]
    cT = jnp.transpose(cTb, (1, 0, 2))
    return logits, (hT, cT)


# ====================== parameter init (folded eval-mode BN) + packing ==============

def init_params(key):
    U, E, H, V = NUM_UNITS, EMBEDDING_SIZE, LSTM_HIDDEN, VOCAB_SIZE
    keys = iter(jax.random.split(key, 64))

    def nrm(shape, scale=0.1):
        return scale * jax.random.normal(next(keys), shape, dtype=jnp.float32)

    def bn(c):
        gamma = 1.0 + 0.1 * jax.random.normal(next(keys), (c,), dtype=jnp.float32)
        beta = 0.1 * jax.random.normal(next(keys), (c,), dtype=jnp.float32)
        mean = 0.1 * jax.random.normal(next(keys), (c,), dtype=jnp.float32)
        var = jax.random.uniform(next(keys), (c,), minval=0.5, maxval=1.5, dtype=jnp.float32)
        scale = gamma / jnp.sqrt(var + BN_EPS)
        bias = beta - mean * scale
        return scale, bias

    # ---- TNet (BN folded, weights stored transposed: [C_in, C_out]) ----
    s0, t0 = bn(C_IN)                               # input_batch_norm
    W1, b1 = nrm((U, C_IN)), nrm((U,))
    s1, t1 = bn(U)
    A1 = s1[:, None] * W1 * s0[None, :]
    c1 = s1 * (W1 @ t0 + b1) + t1
    A1T = A1.T                                      # [C_IN, U]

    W2, b2 = nrm((2 * U, U)), nrm((2 * U,))
    s2, t2 = bn(2 * U)
    A2T, c2r = (s2[:, None] * W2).T, (s2 * b2 + t2)[None, :]

    W3, b3 = nrm((4 * U, 2 * U)), nrm((4 * U,))
    s3, t3 = bn(4 * U)
    A3T, c3r = (s3[:, None] * W3).T, (s3 * b3 + t3)[None, :]

    Wf1, bf1 = nrm((2 * U, 4 * U)), nrm((2 * U,))
    s4, t4 = bn(2 * U)
    A4T, c4r = (s4[:, None] * Wf1).T, (s4 * bf1 + t4)[None, :]

    Wf2, bf2 = nrm((U, 2 * U)), nrm((U,))
    s5, t5 = bn(U)
    A5T, c5r = (s5[:, None] * Wf2).T, (s5 * bf2 + t5)[None, :]

    emb = nrm((V, E), scale=1.0)

    # ---- LSTM (PyTorch gate order i, f, g, o), gates concatenated ----
    w_ih = nrm((4 * H, E))
    w_hh = nrm((4 * H, H))
    b_ih = nrm((4 * H,))
    b_hh = nrm((4 * H,))

    # ---- output layer (ion | relu(lstm)) -> vocab ----
    Wout, bout = nrm((V, U + H)), nrm((V,))

    return dict(
        A1aT=A1T[:VI, :], a1b_row=A1T[VI:, :], c1r=c1[None, :],
        A2T=A2T, c2r=c2r, A3T=A3T, c3r=c3r, A4T=A4T, c4r=c4r, A5T=A5T, c5r=c5r,
        emb=emb,
        w_ih_all=w_ih.T,                      # [E, 4H]
        w_hh_all=w_hh.T,                      # [H, 4H]
        b_all=(b_ih + b_hh)[None, :],         # [1, 4H]
        w_head=Wout.T,                        # [U+H, V]
        b_head=bout[None, :],                 # [1, V]
    )


def pack_params(lp):
    """Pack the logical f32 params into the two kernel slabs (bf16 mats, f32 biases)."""
    mat = np.zeros((MAT_SLAB_ROWS, 128), np.float32)

    def put(name, arr):
        off, r, c = _MAT_OFFSETS[name]
        a = np.asarray(arr, np.float32)
        assert a.shape[0] <= r and a.shape[1] <= c
        mat[off:off + a.shape[0], :a.shape[1]] = a

    put('A1aT', lp['A1aT'])
    put('A2T', lp['A2T'])
    put('A3T', lp['A3T'])
    put('A4T', lp['A4T'])
    put('A5T', lp['A5T'])
    emb_wih = np.asarray(
        jnp.dot(lp['emb'], lp['w_ih_all'], precision=jax.lax.Precision.HIGHEST),
        np.float32)                                        # fold embedding into W_ih
    put('emb_wih', emb_wih)
    put('w_hh', lp['w_hh_all'])
    put('w_head_ion', lp['w_head'][:NUM_UNITS, :])
    put('w_head_lstm', lp['w_head'][NUM_UNITS:, :])

    bias = np.zeros((8, 128), np.float32)

    def putb(name, arr):
        a = np.asarray(arr, np.float32).reshape(-1)
        bias[_BIAS_ROW[name], :a.shape[0]] = a

    putb('a1b', lp['a1b_row'])
    putb('c1', lp['c1r']); putb('c2', lp['c2r']); putb('c3', lp['c3r'])
    putb('c4', lp['c4r']); putb('c5', lp['c5r'])
    putb('b_all', lp['b_all']); putb('b_head', lp['b_head'])

    return dict(wm=jnp.asarray(mat, jnp.bfloat16),
                bias=jnp.asarray(bias, jnp.float32))


# ====================== pure-JAX f32 reference (same folded params) =================

def reference_forward(p, location_index, peaks_location, peaks_intensity, aa_input, h0, c0):
    B, T, V, I = location_index.shape
    N = peaks_location.shape[1]
    U, H = NUM_UNITS, LSTM_HIDDEN
    hp = jax.lax.Precision.HIGHEST

    ploc = jnp.broadcast_to(peaks_location.reshape(B, 1, N, 1).astype(jnp.float32), (B, T, N, 1))
    pint = jnp.broadcast_to(peaks_intensity.reshape(B, 1, N, 1).astype(jnp.float32), (B, T, N, 1))
    li = location_index.astype(jnp.float32).reshape(B, T, 1, V * I)
    d = jnp.exp(-jnp.abs((ploc - li) * DISTANCE_SCALE_FACTOR))
    d = d * (ploc > 1e-5).astype(jnp.float32) * (li > 1e-5).astype(jnp.float32)
    feat = jnp.concatenate([d, pint], axis=3)                 # [B, T, N, C_IN]
    X = feat.reshape(B * T, N, C_IN)

    A1T_full = jnp.concatenate([p['A1aT'], p['a1b_row']], axis=0)   # [C_IN, U]
    h1 = _relu(jnp.matmul(X, A1T_full, precision=hp) + p['c1r'])
    h2 = _relu(jnp.matmul(h1, p['A2T'], precision=hp) + p['c2r'])
    h3 = _relu(jnp.matmul(h2, p['A3T'], precision=hp) + p['c3r'])
    z = jnp.max(h3, axis=1)                                   # [BT, 4U]
    f1 = _relu(jnp.dot(z, p['A4T'], precision=hp) + p['c4r'])
    f2 = _relu(jnp.dot(f1, p['A5T'], precision=hp) + p['c5r'])
    ion = f2.reshape(B, T, U)

    emb = p['emb'][aa_input]
    h, c = h0[0], c0[0]
    outs = []
    for t in range(T):
        xt = emb[:, t]
        g = (jnp.dot(xt, p['w_ih_all'], precision=hp)
             + jnp.dot(h, p['w_hh_all'], precision=hp) + p['b_all'])
        i_g = jax.nn.sigmoid(g[:, 0 * H:1 * H])
        f_g = jax.nn.sigmoid(g[:, 1 * H:2 * H])
        g_g = jnp.tanh(g[:, 2 * H:3 * H])
        o_g = jax.nn.sigmoid(g[:, 3 * H:4 * H])
        c = f_g * c + i_g * g_g
        h = o_g * jnp.tanh(c)
        outs.append(h)
    lstm_out = jnp.stack(outs, axis=1)                        # [B, T, H]

    head_in = jnp.concatenate([ion, _relu(lstm_out)], axis=2).reshape(B * T, U + H)
    logits = jnp.dot(head_in, p['w_head'], precision=hp) + p['b_head']
    return logits.reshape(B, T, V), (h[None], c[None])


# ====================== main ======================

if __name__ == "__main__":
    key = jax.random.PRNGKey(0)
    pkey, dkey = jax.random.split(key)
    logical_params = init_params(pkey)
    kernel_params = pack_params(logical_params)

    B, T, N = 2, 4, 16
    k1, k2, k3, k4, k5 = jax.random.split(dkey, 5)
    location_index = jax.random.uniform(k1, (B, T, VOCAB_SIZE, NUM_ION), dtype=jnp.float32)
    location_index = location_index * (jax.random.uniform(k4, location_index.shape) > 0.2).astype(jnp.float32)
    peaks_location = jax.random.uniform(k2, (B, N), dtype=jnp.float32)
    peaks_location = peaks_location.at[:, -2:].set(0.0)      # exercise the >1e-5 peak mask
    peaks_intensity = jax.random.uniform(k3, (B, N), dtype=jnp.float32)
    aa_input = jax.random.randint(k5, (B, T), 0, VOCAB_SIZE, dtype=jnp.int32)

    logits, (hT, cT) = forward(kernel_params, location_index, peaks_location,
                               peaks_intensity, aa_input, state_tuple=None)
    jax.block_until_ready((logits, hT, cT))

    h0 = jnp.zeros((NUM_LSTM_LAYERS, B, LSTM_HIDDEN), jnp.float32)
    c0 = jnp.zeros((NUM_LSTM_LAYERS, B, LSTM_HIDDEN), jnp.float32)
    ref_logits, (ref_h, ref_c) = reference_forward(
        logical_params, location_index, peaks_location, peaks_intensity, aa_input, h0, c0)

    assert logits.shape == (B, T, VOCAB_SIZE)
    assert hT.shape == (NUM_LSTM_LAYERS, B, LSTM_HIDDEN)
    max_diff = float(np.max(np.abs(np.asarray(logits) - np.asarray(ref_logits))))
    assert np.allclose(np.asarray(logits), np.asarray(ref_logits), atol=2e-2, rtol=2e-2), \
        f"logits mismatch, max abs diff = {max_diff}"
    assert np.allclose(np.asarray(hT), np.asarray(ref_h), atol=2e-2, rtol=2e-2)
    assert np.allclose(np.asarray(cT), np.asarray(ref_c), atol=2e-2, rtol=2e-2)

    print("KERNEL_OK")
</pallas_src>

<mosaic_0001>
module attributes {stable_mosaic.version = 11 : i64} {
  func.func @_fused_kernel(%arg0: i32, %arg1: memref<2x4xi32, #tpu.memory_space<smem>>, %arg2: memref<1x4x208xf32, #tpu.memory_space<vmem>>, %arg3: memref<1x16x1xf32, #tpu.memory_space<vmem>>, %arg4: memref<1x16x1xf32, #tpu.memory_space<vmem>>, %arg5: memref<1x1x32xf32, #tpu.memory_space<vmem>>, %arg6: memref<1x1x32xf32, #tpu.memory_space<vmem>>, %arg7: memref<624x128xbf16, #tpu.memory_space<vmem>>, %arg8: memref<8x128xf32, #tpu.memory_space<vmem>>, %arg9: memref<1x4x26xf32, #tpu.memory_space<vmem>>, %arg10: memref<1x1x32xf32, #tpu.memory_space<vmem>>, %arg11: memref<1x1x32xf32, #tpu.memory_space<vmem>>) attributes {dimension_semantics = [#tpu.dimension_semantics<parallel>], iteration_bounds = array<i64: 2>, scalar_prefetch = 1 : i64, scratch_operands = 0 : i64, tpu.core_type = #tpu.core_type<tc>, window_params = [{transform_indices = @transform_0, window_bounds = array<i64: 1, 4, 208>}, {transform_indices = @transform_1, window_bounds = array<i64: 1, 16, 1>}, {transform_indices = @transform_2, window_bounds = array<i64: 1, 16, 1>}, {transform_indices = @transform_3, window_bounds = array<i64: 1, 1, 32>}, {transform_indices = @transform_4, window_bounds = array<i64: 1, 1, 32>}, {pipeline_mode = #tpu.pipeline_mode<synchronous>, transform_indices = @transform_5, window_bounds = array<i64: 624, 128>}, {pipeline_mode = #tpu.pipeline_mode<synchronous>, transform_indices = @transform_6, window_bounds = array<i64: 8, 128>}, {transform_indices = @transform_7, window_bounds = array<i64: 1, 4, 26>}, {transform_indices = @transform_8, window_bounds = array<i64: 1, 1, 32>}, {transform_indices = @transform_9, window_bounds = array<i64: 1, 1, 32>}]} {
    %c0 = arith.constant 0 : index
    %c0_0 = arith.constant 0 : index
    %c0_1 = arith.constant 0 : index
    %0 = vector.load %arg2[%c0, %c0_0, %c0_1] : memref<1x4x208xf32, #tpu.memory_space<vmem>>, vector<1x4x208xf32>
    %1 = vector.shape_cast %0 : vector<1x4x208xf32> to vector<4x208xf32>
    %c0_2 = arith.constant 0 : index
    %c0_3 = arith.constant 0 : index
    %c0_4 = arith.constant 0 : index
    %2 = vector.load %arg3[%c0_2, %c0_3, %c0_4] : memref<1x16x1xf32, #tpu.memory_space<vmem>>, vector<1x16x1xf32>
    %3 = vector.shape_cast %2 : vector<1x16x1xf32> to vector<16x1xf32>
    %c0_5 = arith.constant 0 : index
    %c0_6 = arith.constant 0 : index
    %c0_7 = arith.constant 0 : index
    %4 = vector.load %arg4[%c0_5, %c0_6, %c0_7] : memref<1x16x1xf32, #tpu.memory_space<vmem>>, vector<1x16x1xf32>
    %5 = vector.shape_cast %4 : vector<1x16x1xf32> to vector<16x1xf32>
    %cst = arith.constant 9.99999974E-6 : f32
    %6 = vector.broadcast %cst : f32 to vector<16x1xf32>
    %7 = arith.cmpf ogt, %3, %6 : vector<16x1xf32>
    %8 = vector.extract_strided_slice %1 {offsets = [0, 0], sizes = [1, 208], strides = [1, 1]} : vector<4x208xf32> to vector<1x208xf32>
    %9 = vector.broadcast %3 : vector<16x1xf32> to vector<16x208xf32>
    %10 = vector.broadcast %8 : vector<1x208xf32> to vector<16x208xf32>
    %11 = arith.subf %9, %10 : vector<16x208xf32>
    %cst_8 = arith.constant 1.000000e+01 : f32
    %12 = vector.broadcast %cst_8 : f32 to vector<16x208xf32>
    %13 = arith.mulf %11, %12 : vector<16x208xf32>
    %14 = math.absf %13 : vector<16x208xf32>
    %cst_9 = arith.constant 0.000000e+00 : f32
    %15 = vector.broadcast %cst_9 : f32 to vector<16x208xf32>
    %16 = arith.subf %15, %14 : vector<16x208xf32>
    %17 = math.exp %16 : vector<16x208xf32>
    %cst_10 = arith.constant 9.99999974E-6 : f32
    %18 = vector.broadcast %cst_10 : f32 to vector<1x208xf32>
    %19 = arith.cmpf ogt, %8, %18 : vector<1x208xf32>
    %20 = vector.broadcast %7 : vector<16x1xi1> to vector<16x208xi1>
    %21 = vector.broadcast %19 : vector<1x208xi1> to vector<16x208xi1>
    %22 = arith.andi %20, %21 : vector<16x208xi1>
    %cst_11 = arith.constant 0.000000e+00 : f32
    %23 = vector.broadcast %cst_11 : f32 to vector<16x208xf32>
    %24 = arith.select %22, %17, %23 : vector<16x208xi1>, vector<16x208xf32>
    %25 = vector.extract_strided_slice %1 {offsets = [1, 0], sizes = [1, 208], strides = [1, 1]} : vector<4x208xf32> to vector<1x208xf32>
    %26 = vector.broadcast %3 : vector<16x1xf32> to vector<16x208xf32>
    %27 = vector.broadcast %25 : vector<1x208xf32> to vector<16x208xf32>
    %28 = arith.subf %26, %27 : vector<16x208xf32>
    %cst_12 = arith.constant 1.000000e+01 : f32
    %29 = vector.broadcast %cst_12 : f32 to vector<16x208xf32>
    %30 = arith.mulf %28, %29 : vector<16x208xf32>
    %31 = math.absf %30 : vector<16x208xf32>
    %cst_13 = arith.constant 0.000000e+00 : f32
    %32 = vector.broadcast %cst_13 : f32 to vector<16x208xf32>
    %33 = arith.subf %32, %31 : vector<16x208xf32>
    %34 = math.exp %33 : vector<16x208xf32>
    %cst_14 = arith.constant 9.99999974E-6 : f32
    %35 = vector.broadcast %cst_14 : f32 to vector<1x208xf32>
    %36 = arith.cmpf ogt, %25, %35 : vector<1x208xf32>
    %37 = vector.broadcast %7 : vector<16x1xi1> to vector<16x208xi1>
    %38 = vector.broadcast %36 : vector<1x208xi1> to vector<16x208xi1>
    %39 = arith.andi %37, %38 : vector<16x208xi1>
    %cst_15 = arith.constant 0.000000e+00 : f32
    %40 = vector.broadcast %cst_15 : f32 to vector<16x208xf32>
    %41 = arith.select %39, %34, %40 : vector<16x208xi1>, vector<16x208xf32>
    %42 = vector.extract_strided_slice %1 {offsets = [2, 0], sizes = [1, 208], strides = [1, 1]} : vector<4x208xf32> to vector<1x208xf32>
    %43 = vector.broadcast %3 : vector<16x1xf32> to vector<16x208xf32>
    %44 = vector.broadcast %42 : vector<1x208xf32> to vector<16x208xf32>
    %45 = arith.subf %43, %44 : vector<16x208xf32>
    %cst_16 = arith.constant 1.000000e+01 : f32
    %46 = vector.broadcast %cst_16 : f32 to vector<16x208xf32>
    %47 = arith.mulf %45, %46 : vector<16x208xf32>
    %48 = math.absf %47 : vector<16x208xf32>
    %cst_17 = arith.constant 0.000000e+00 : f32
    %49 = vector.broadcast %cst_17 : f32 to vector<16x208xf32>
    %50 = arith.subf %49, %48 : vector<16x208xf32>
    %51 = math.exp %50 : vector<16x208xf32>
    %cst_18 = arith.constant 9.99999974E-6 : f32
    %52 = vector.broadcast %cst_18 : f32 to vector<1x208xf32>
    %53 = arith.cmpf ogt, %42, %52 : vector<1x208xf32>
    %54 = vector.broadcast %7 : vector<16x1xi1> to vector<16x208xi1>
    %55 = vector.broadcast %53 : vector<1x208xi1> to vector<16x208xi1>
    %56 = arith.andi %54, %55 : vector<16x208xi1>
    %cst_19 = arith.constant 0.000000e+00 : f32
    %57 = vector.broadcast %cst_19 : f32 to vector<16x208xf32>
    %58 = arith.select %56, %51, %57 : vector<16x208xi1>, vector<16x208xf32>
    %59 = vector.extract_strided_slice %1 {offsets = [3, 0], sizes = [1, 208], strides = [1, 1]} : vector<4x208xf32> to vector<1x208xf32>
    %60 = vector.broadcast %3 : vector<16x1xf32> to vector<16x208xf32>
    %61 = vector.broadcast %59 : vector<1x208xf32> to vector<16x208xf32>
    %62 = arith.subf %60, %61 : vector<16x208xf32>
    %cst_20 = arith.constant 1.000000e+01 : f32
    %63 = vector.broadcast %cst_20 : f32 to vector<16x208xf32>
    %64 = arith.mulf %62, %63 : vector<16x208xf32>
    %65 = math.absf %64 : vector<16x208xf32>
    %cst_21 = arith.constant 0.000000e+00 : f32
    %66 = vector.broadcast %cst_21 : f32 to vector<16x208xf32>
    %67 = arith.subf %66, %65 : vector<16x208xf32>
    %68 = math.exp %67 : vector<16x208xf32>
    %cst_22 = arith.constant 9.99999974E-6 : f32
    %69 = vector.broadcast %cst_22 : f32 to vector<1x208xf32>
    %70 = arith.cmpf ogt, %59, %69 : vector<1x208xf32>
    %71 = vector.broadcast %7 : vector<16x1xi1> to vector<16x208xi1>
    %72 = vector.broadcast %70 : vector<1x208xi1> to vector<16x208xi1>
    %73 = arith.andi %71, %72 : vector<16x208xi1>
    %cst_23 = arith.constant 0.000000e+00 : f32
    %74 = vector.broadcast %cst_23 : f32 to vector<16x208xf32>
    %75 = arith.select %73, %68, %74 : vector<16x208xi1>, vector<16x208xf32>
    %76 = tpu.concatenate %24, %41, %58, %75 in 0 : vector<16x208xf32>, vector<16x208xf32>, vector<16x208xf32>, vector<16x208xf32> -> vector<64x208xf32>
    %77 = tpu.concatenate %5, %5, %5, %5 in 0 : vector<16x1xf32>, vector<16x1xf32>, vector<16x1xf32>, vector<16x1xf32> -> vector<64x1xf32>
    %c0_24 = arith.constant 0 : index
    %c0_25 = arith.constant 0 : index
    %78 = vector.load %arg7[%c0_24, %c0_25] : memref<624x128xbf16, #tpu.memory_space<vmem>>, vector<208x32xbf16>
    %79 = arith.truncf %76 : vector<64x208xf32> to vector<64x208xbf16>
    %cst_26 = arith.constant dense<0.000000e+00> : vector<64x32xf32>
    %80 = tpu.matmul %79, %78, %cst_26 {dimension_numbers = #tpu.dot_dimension_numbers<[1], [0], [0], [1], [0, 0, 1, 1], [], []>} : vector<64x208xbf16>, vector<208x32xbf16>, vector<64x32xf32> -> vector<64x32xf32>
    %c0_27 = arith.constant 0 : index
    %c0_28 = arith.constant 0 : index
    %81 = vector.load %arg8[%c0_27, %c0_28] : memref<8x128xf32, #tpu.memory_space<vmem>>, vector<1x32xf32>
    %82 = vector.broadcast %77 : vector<64x1xf32> to vector<64x32xf32>
    %83 = vector.broadcast %81 : vector<1x32xf32> to vector<64x32xf32>
    %84 = arith.mulf %82, %83 : vector<64x32xf32>
    %85 = arith.addf %80, %84 : vector<64x32xf32>
    %c1 = arith.constant 1 : index
    %c0_29 = arith.constant 0 : index
    %86 = vector.load %arg8[%c1, %c0_29] : memref<8x128xf32, #tpu.memory_space<vmem>>, vector<1x32xf32>
    %87 = vector.broadcast %86 : vector<1x32xf32> to vector<64x32xf32>
    %88 = arith.addf %85, %87 : vector<64x32xf32>
    %cst_30 = arith.constant 0.000000e+00 : f32
    %89 = vector.broadcast %cst_30 : f32 to vector<64x32xf32>
    %90 = arith.maximumf %88, %89 : vector<64x32xf32>
    %c208 = arith.constant 208 : index
    %c0_31 = arith.constant 0 : index
    %91 = vector.load %arg7[%c208, %c0_31] : memref<624x128xbf16, #tpu.memory_space<vmem>>, vector<32x64xbf16>
    %92 = arith.truncf %90 : vector<64x32xf32> to vector<64x32xbf16>
    %cst_32 = arith.constant dense<0.000000e+00> : vector<64x64xf32>
    %93 = tpu.matmul %92, %91, %cst_32 {dimension_numbers = #tpu.dot_dimension_numbers<[1], [0], [0], [1], [0, 0, 1, 1], [], []>} : vector<64x32xbf16>, vector<32x64xbf16>, vector<64x64xf32> -> vector<64x64xf32>
    %c2 = arith.constant 2 : index
    %c0_33 = arith.constant 0 : index
    %94 = vector.load %arg8[%c2, %c0_33] : memref<8x128xf32, #tpu.memory_space<vmem>>, vector<1x64xf32>
    %95 = vector.broadcast %94 : vector<1x64xf32> to vector<64x64xf32>
    %96 = arith.addf %93, %95 : vector<64x64xf32>
    %cst_34 = arith.constant 0.000000e+00 : f32
    %97 = vector.broadcast %cst_34 : f32 to vector<64x64xf32>
    %98 = arith.maximumf %96, %97 : vector<64x64xf32>
    %c240 = arith.constant 240 : index
    %c0_35 = arith.constant 0 : index
    %99 = vector.load %arg7[%c240, %c0_35] : memref<624x128xbf16, #tpu.memory_space<vmem>>, vector<64x128xbf16>
    %100 = arith.truncf %98 : vector<64x64xf32> to vector<64x64xbf16>
    %cst_36 = arith.constant dense<0.000000e+00> : vector<64x128xf32>
    %101 = tpu.matmul %100, %99, %cst_36 {dimension_numbers = #tpu.dot_dimension_numbers<[1], [0], [0], [1], [0, 0, 1, 1], [], []>} : vector<64x64xbf16>, vector<64x128xbf16>, vector<64x128xf32> -> vector<64x128xf32>
    %c3 = arith.constant 3 : index
    %c0_37 = arith.constant 0 : index
    %102 = vector.load %arg8[%c3, %c0_37] : memref<8x128xf32, #tpu.memory_space<vmem>>, vector<1x128xf32>
    %103 = vector.broadcast %102 : vector<1x128xf32> to vector<64x128xf32>
    %104 = arith.addf %101, %103 : vector<64x128xf32>
    %cst_38 = arith.constant 0.000000e+00 : f32
    %105 = vector.broadcast %cst_38 : f32 to vector<64x128xf32>
    %106 = arith.maximumf %104, %105 : vector<64x128xf32>
    %107 = vector.extract_strided_slice %106 {offsets = [0, 0], sizes = [16, 128], strides = [1, 1]} : vector<64x128xf32> to vector<16x128xf32>
    %cst_39 = arith.constant dense<0xFF800000> : vector<128xf32>
    %108 = vector.multi_reduction <maximumf>, %107, %cst_39 [0] : vector<16x128xf32> to vector<128xf32>
    %109 = vector.shape_cast %108 : vector<128xf32> to vector<1x128xf32>
    %110 = vector.extract_strided_slice %106 {offsets = [16, 0], sizes = [16, 128], strides = [1, 1]} : vector<64x128xf32> to vector<16x128xf32>
    %cst_40 = arith.constant dense<0xFF800000> : vector<128xf32>
    %111 = vector.multi_reduction <maximumf>, %110, %cst_40 [0] : vector<16x128xf32> to vector<128xf32>
    %112 = vector.shape_cast %111 : vector<128xf32> to vector<1x128xf32>
    %113 = vector.extract_strided_slice %106 {offsets = [32, 0], sizes = [16, 128], strides = [1, 1]} : vector<64x128xf32> to vector<16x128xf32>
    %cst_41 = arith.constant dense<0xFF800000> : vector<128xf32>
    %114 = vector.multi_reduction <maximumf>, %113, %cst_41 [0] : vector<16x128xf32> to vector<128xf32>
    %115 = vector.shape_cast %114 : vector<128xf32> to vector<1x128xf32>
    %116 = vector.extract_strided_slice %106 {offsets = [48, 0], sizes = [16, 128], strides = [1, 1]} : vector<64x128xf32> to vector<16x128xf32>
    %cst_42 = arith.constant dense<0xFF800000> : vector<128xf32>
    %117 = vector.multi_reduction <maximumf>, %116, %cst_42 [0] : vector<16x128xf32> to vector<128xf32>
    %118 = vector.shape_cast %117 : vector<128xf32> to vector<1x128xf32>
    %119 = tpu.concatenate %109, %112, %115, %118 in 0 : vector<1x128xf32>, vector<1x128xf32>, vector<1x128xf32>, vector<1x128xf32> -> vector<4x128xf32>
    %c304 = arith.constant 304 : index
    %c0_43 = arith.constant 0 : index
    %120 = vector.load %arg7[%c304, %c0_43] : memref<624x128xbf16, #tpu.memory_space<vmem>>, vector<128x64xbf16>
    %121 = arith.truncf %119 : vector<4x128xf32> to vector<4x128xbf16>
    %cst_44 = arith.constant dense<0.000000e+00> : vector<4x64xf32>
    %122 = tpu.matmul %121, %120, %cst_44 {dimension_numbers = #tpu.dot_dimension_numbers<[1], [0], [0], [1], [0, 0, 1, 1], [], []>} : vector<4x128xbf16>, vector<128x64xbf16>, vector<4x64xf32> -> vector<4x64xf32>
    %c4 = arith.constant 4 : index
    %c0_45 = arith.constant 0 : index
    %123 = vector.load %arg8[%c4, %c0_45] : memref<8x128xf32, #tpu.memory_space<vmem>>, vector<1x64xf32>
    %124 = vector.broadcast %123 : vector<1x64xf32> to vector<4x64xf32>
    %125 = arith.addf %122, %124 : vector<4x64xf32>
    %cst_46 = arith.constant 0.000000e+00 : f32
    %126 = vector.broadcast %cst_46 : f32 to vector<4x64xf32>
    %127 = arith.maximumf %125, %126 : vector<4x64xf32>
    %c432 = arith.constant 432 : index
    %c0_47 = arith.constant 0 : index
    %128 = vector.load %arg7[%c432, %c0_47] : memref<624x128xbf16, #tpu.memory_space<vmem>>, vector<64x32xbf16>
    %129 = arith.truncf %127 : vector<4x64xf32> to vector<4x64xbf16>
    %cst_48 = arith.constant dense<0.000000e+00> : vector<4x32xf32>
    %130 = tpu.matmul %129, %128, %cst_48 {dimension_numbers = #tpu.dot_dimension_numbers<[1], [0], [0], [1], [0, 0, 1, 1], [], []>} : vector<4x64xbf16>, vector<64x32xbf16>, vector<4x32xf32> -> vector<4x32xf32>
    %c5 = arith.constant 5 : index
    %c0_49 = arith.constant 0 : index
    %131 = vector.load %arg8[%c5, %c0_49] : memref<8x128xf32, #tpu.memory_space<vmem>>, vector<1x32xf32>
    %132 = vector.broadcast %131 : vector<1x32xf32> to vector<4x32xf32>
    %133 = arith.addf %130, %132 : vector<4x32xf32>
    %cst_50 = arith.constant 0.000000e+00 : f32
    %134 = vector.broadcast %cst_50 : f32 to vector<4x32xf32>
    %135 = arith.maximumf %133, %134 : vector<4x32xf32>
    %c496 = arith.constant 496 : index
    %c0_51 = arith.constant 0 : index
    %136 = vector.load %arg7[%c496, %c0_51] : memref<624x128xbf16, #tpu.memory_space<vmem>>, vector<32x128xbf16>
    %137 = tpu.iota {dimensions = array<i32: 1>} : vector<1x32xi32>
    %138 = arith.index_cast %arg0 : i32 to index
    %c0_52 = arith.constant 0 : index
    %139 = memref.load %arg1[%138, %c0_52] : memref<2x4xi32, #tpu.memory_space<smem>>
    %140 = vector.broadcast %139 : i32 to vector<1x32xi32>
    %141 = arith.cmpi eq, %137, %140 : vector<1x32xi32>
    %142 = arith.extui %141 : vector<1x32xi1> to vector<1x32xi32>
    %143 = arith.sitofp %142 : vector<1x32xi32> to vector<1x32xf32>
    %144 = arith.index_cast %arg0 : i32 to index
    %c1_53 = arith.constant 1 : index
    %145 = memref.load %arg1[%144, %c1_53] : memref<2x4xi32, #tpu.memory_space<smem>>
    %146 = vector.broadcast %145 : i32 to vector<1x32xi32>
    %147 = arith.cmpi eq, %137, %146 : vector<1x32xi32>
    %148 = arith.extui %147 : vector<1x32xi1> to vector<1x32xi32>
    %149 = arith.sitofp %148 : vector<1x32xi32> to vector<1x32xf32>
    %150 = arith.index_cast %arg0 : i32 to index
    %c2_54 = arith.constant 2 : index
    %151 = memref.load %arg1[%150, %c2_54] : memref<2x4xi32, #tpu.memory_space<smem>>
    %152 = vector.broadcast %151 : i32 to vector<1x32xi32>
    %153 = arith.cmpi eq, %137, %152 : vector<1x32xi32>
    %154 = arith.extui %153 : vector<1x32xi1> to vector<1x32xi32>
    %155 = arith.sitofp %154 : vector<1x32xi32> to vector<1x32xf32>
    %156 = arith.index_cast %arg0 : i32 to index
    %c3_55 = arith.constant 3 : index
    %157 = memref.load %arg1[%156, %c3_55] : memref<2x4xi32, #tpu.memory_space<smem>>
    %158 = vector.broadcast %157 : i32 to vector<1x32xi32>
    %159 = arith.cmpi eq, %137, %158 : vector<1x32xi32>
    %160 = arith.extui %159 : vector<1x32xi1> to vector<1x32xi32>
    %161 = arith.sitofp %160 : vector<1x32xi32> to vector<1x32xf32>
    %162 = tpu.concatenate %143, %149, %155, %161 in 0 : vector<1x32xf32>, vector<1x32xf32>, vector<1x32xf32>, vector<1x32xf32> -> vector<4x32xf32>
    %163 = arith.truncf %162 : vector<4x32xf32> to vector<4x32xbf16>
    %cst_56 = arith.constant dense<0.000000e+00> : vector<4x128xf32>
    %164 = tpu.matmul %163, %136, %cst_56 {dimension_numbers = #tpu.dot_dimension_numbers<[1], [0], [0], [1], [0, 0, 1, 1], [], []>} : vector<4x32xbf16>, vector<32x128xbf16>, vector<4x128xf32> -> vector<4x128xf32>
    %c6 = arith.constant 6 : index
    %c0_57 = arith.constant 0 : index
    %165 = vector.load %arg8[%c6, %c0_57] : memref<8x128xf32, #tpu.memory_space<vmem>>, vector<1x128xf32>
    %166 = vector.broadcast %165 : vector<1x128xf32> to vector<4x128xf32>
    %167 = arith.addf %164, %166 : vector<4x128xf32>
    %c528 = arith.constant 528 : index
    %c0_58 = arith.constant 0 : index
    %168 = vector.load %arg7[%c528, %c0_58] : memref<624x128xbf16, #tpu.memory_space<vmem>>, vector<32x128xbf16>
    %c0_59 = arith.constant 0 : index
    %c0_60 = arith.constant 0 : index
    %c0_61 = arith.constant 0 : index
    %169 = vector.load %arg5[%c0_59, %c0_60, %c0_61] : memref<1x1x32xf32, #tpu.memory_space<vmem>>, vector<1x1x32xf32>
    %170 = vector.shape_cast %169 : vector<1x1x32xf32> to vector<1x32xf32>
    %c0_62 = arith.constant 0 : index
    %c0_63 = arith.constant 0 : index
    %c0_64 = arith.constant 0 : index
    %171 = vector.load %arg6[%c0_62, %c0_63, %c0_64] : memref<1x1x32xf32, #tpu.memory_space<vmem>>, vector<1x1x32xf32>
    %172 = vector.shape_cast %171 : vector<1x1x32xf32> to vector<1x32xf32>
    %173 = vector.extract_strided_slice %167 {offsets = [0, 0], sizes = [1, 128], strides = [1, 1]} : vector<4x128xf32> to vector<1x128xf32>
    %174 = arith.truncf %170 : vector<1x32xf32> to vector<1x32xbf16>
    %cst_65 = arith.constant dense<0.000000e+00> : vector<1x128xf32>
    %175 = tpu.matmul %174, %168, %cst_65 {dimension_numbers = #tpu.dot_dimension_numbers<[1], [0], [0], [1], [0, 0, 1, 1], [], []>} : vector<1x32xbf16>, vector<32x128xbf16>, vector<1x128xf32> -> vector<1x128xf32>
    %176 = arith.addf %173, %175 : vector<1x128xf32>
    %177 = vector.extract_strided_slice %176 {offsets = [0, 0], sizes = [1, 32], strides = [1, 1]} : vector<1x128xf32> to vector<1x32xf32>
    %178 = arith.negf %177 : vector<1x32xf32>
    %179 = math.exp %178 : vector<1x32xf32>
    %cst_66 = arith.constant 1.000000e+00 : f32
    %180 = vector.broadcast %cst_66 : f32 to vector<1x32xf32>
    %181 = arith.addf %180, %179 : vector<1x32xf32>
    %182 = arith.divf %180, %181 : vector<1x32xf32>
    %183 = vector.extract_strided_slice %176 {offsets = [0, 32], sizes = [1, 32], strides = [1, 1]} : vector<1x128xf32> to vector<1x32xf32>
    %184 = arith.negf %183 : vector<1x32xf32>
    %185 = math.exp %184 : vector<1x32xf32>
    %cst_67 = arith.constant 1.000000e+00 : f32
    %186 = vector.broadcast %cst_67 : f32 to vector<1x32xf32>
    %187 = arith.addf %186, %185 : vector<1x32xf32>
    %188 = arith.divf %186, %187 : vector<1x32xf32>
    %189 = vector.extract_strided_slice %176 {offsets = [0, 64], sizes = [1, 32], strides = [1, 1]} : vector<1x128xf32> to vector<1x32xf32>
    %190 = math.tanh %189 : vector<1x32xf32>
    %191 = vector.extract_strided_slice %176 {offsets = [0, 96], sizes = [1, 32], strides = [1, 1]} : vector<1x128xf32> to vector<1x32xf32>
    %192 = arith.negf %191 : vector<1x32xf32>
    %193 = math.exp %192 : vector<1x32xf32>
    %cst_68 = arith.constant 1.000000e+00 : f32
    %194 = vector.broadcast %cst_68 : f32 to vector<1x32xf32>
    %195 = arith.addf %194, %193 : vector<1x32xf32>
    %196 = arith.divf %194, %195 : vector<1x32xf32>
    %197 = arith.mulf %188, %172 : vector<1x32xf32>
    %198 = arith.mulf %182, %190 : vector<1x32xf32>
    %199 = arith.addf %197, %198 : vector<1x32xf32>
    %200 = math.tanh %199 : vector<1x32xf32>
    %201 = arith.mulf %196, %200 : vector<1x32xf32>
    %cst_69 = arith.constant 0.000000e+00 : f32
    %202 = vector.broadcast %cst_69 : f32 to vector<1x32xf32>
    %203 = arith.maximumf %201, %202 : vector<1x32xf32>
    %204 = vector.extract_strided_slice %167 {offsets = [1, 0], sizes = [1, 128], strides = [1, 1]} : vector<4x128xf32> to vector<1x128xf32>
    %205 = arith.truncf %201 : vector<1x32xf32> to vector<1x32xbf16>
    %cst_70 = arith.constant dense<0.000000e+00> : vector<1x128xf32>
    %206 = tpu.matmul %205, %168, %cst_70 {dimension_numbers = #tpu.dot_dimension_numbers<[1], [0], [0], [1], [0, 0, 1, 1], [], []>} : vector<1x32xbf16>, vector<32x128xbf16>, vector<1x128xf32> -> vector<1x128xf32>
    %207 = arith.addf %204, %206 : vector<1x128xf32>
    %208 = vector.extract_strided_slice %207 {offsets = [0, 0], sizes = [1, 32], strides = [1, 1]} : vector<1x128xf32> to vector<1x32xf32>
    %209 = arith.negf %208 : vector<1x32xf32>
    %210 = math.exp %209 : vector<1x32xf32>
    %cst_71 = arith.constant 1.000000e+00 : f32
    %211 = vector.broadcast %cst_71 : f32 to vector<1x32xf32>
    %212 = arith.addf %211, %210 : vector<1x32xf32>
    %213 = arith.divf %211, %212 : vector<1x32xf32>
    %214 = vector.extract_strided_slice %207 {offsets = [0, 32], sizes = [1, 32], strides = [1, 1]} : vector<1x128xf32> to vector<1x32xf32>
    %215 = arith.negf %214 : vector<1x32xf32>
    %216 = math.exp %215 : vector<1x32xf32>
    %cst_72 = arith.constant 1.000000e+00 : f32
    %217 = vector.broadcast %cst_72 : f32 to vector<1x32xf32>
    %218 = arith.addf %217, %216 : vector<1x32xf32>
    %219 = arith.divf %217, %218 : vector<1x32xf32>
    %220 = vector.extract_strided_slice %207 {offsets = [0, 64], sizes = [1, 32], strides = [1, 1]} : vector<1x128xf32> to vector<1x32xf32>
    %221 = math.tanh %220 : vector<1x32xf32>
    %222 = vector.extract_strided_slice %207 {offsets = [0, 96], sizes = [1, 32], strides = [1, 1]} : vector<1x128xf32> to vector<1x32xf32>
    %223 = arith.negf %222 : vector<1x32xf32>
    %224 = math.exp %223 : vector<1x32xf32>
    %cst_73 = arith.constant 1.000000e+00 : f32
    %225 = vector.broadcast %cst_73 : f32 to vector<1x32xf32>
    %226 = arith.addf %225, %224 : vector<1x32xf32>
    %227 = arith.divf %225, %226 : vector<1x32xf32>
    %228 = arith.mulf %219, %199 : vector<1x32xf32>
    %229 = arith.mulf %213, %221 : vector<1x32xf32>
    %230 = arith.addf %228, %229 : vector<1x32xf32>
    %231 = math.tanh %230 : vector<1x32xf32>
    %232 = arith.mulf %227, %231 : vector<1x32xf32>
    %cst_74 = arith.constant 0.000000e+00 : f32
    %233 = vector.broadcast %cst_74 : f32 to vector<1x32xf32>
    %234 = arith.maximumf %232, %233 : vector<1x32xf32>
    %235 = vector.extract_strided_slice %167 {offsets = [2, 0], sizes = [1, 128], strides = [1, 1]} : vector<4x128xf32> to vector<1x128xf32>
    %236 = arith.truncf %232 : vector<1x32xf32> to vector<1x32xbf16>
    %cst_75 = arith.constant dense<0.000000e+00> : vector<1x128xf32>
    %237 = tpu.matmul %236, %168, %cst_75 {dimension_numbers = #tpu.dot_dimension_numbers<[1], [0], [0], [1], [0, 0, 1, 1], [], []>} : vector<1x32xbf16>, vector<32x128xbf16>, vector<1x128xf32> -> vector<1x128xf32>
    %238 = arith.addf %235, %237 : vector<1x128xf32>
    %239 = vector.extract_strided_slice %238 {offsets = [0, 0], sizes = [1, 32], strides = [1, 1]} : vector<1x128xf32> to vector<1x32xf32>
    %240 = arith.negf %239 : vector<1x32xf32>
    %241 = math.exp %240 : vector<1x32xf32>
    %cst_76 = arith.constant 1.000000e+00 : f32
    %242 = vector.broadcast %cst_76 : f32 to vector<1x32xf32>
    %243 = arith.addf %242, %241 : vector<1x32xf32>
    %244 = arith.divf %242, %243 : vector<1x32xf32>
    %245 = vector.extract_strided_slice %238 {offsets = [0, 32], sizes = [1, 32], strides = [1, 1]} : vector<1x128xf32> to vector<1x32xf32>
    %246 = arith.negf %245 : vector<1x32xf32>
    %247 = math.exp %246 : vector<1x32xf32>
    %cst_77 = arith.constant 1.000000e+00 : f32
    %248 = vector.broadcast %cst_77 : f32 to vector<1x32xf32>
    %249 = arith.addf %248, %247 : vector<1x32xf32>
    %250 = arith.divf %248, %249 : vector<1x32xf32>
    %251 = vector.extract_strided_slice %238 {offsets = [0, 64], sizes = [1, 32], strides = [1, 1]} : vector<1x128xf32> to vector<1x32xf32>
    %252 = math.tanh %251 : vector<1x32xf32>
    %253 = vector.extract_strided_slice %238 {offsets = [0, 96], sizes = [1, 32], strides = [1, 1]} : vector<1x128xf32> to vector<1x32xf32>
    %254 = arith.negf %253 : vector<1x32xf32>
    %255 = math.exp %254 : vector<1x32xf32>
    %cst_78 = arith.constant 1.000000e+00 : f32
    %256 = vector.broadcast %cst_78 : f32 to vector<1x32xf32>
    %257 = arith.addf %256, %255 : vector<1x32xf32>
    %258 = arith.divf %256, %257 : vector<1x32xf32>
    %259 = arith.mulf %250, %230 : vector<1x32xf32>
    %260 = arith.mulf %244, %252 : vector<1x32xf32>
    %261 = arith.addf %259, %260 : vector<1x32xf32>
    %262 = math.tanh %261 : vector<1x32xf32>
    %263 = arith.mulf %258, %262 : vector<1x32xf32>
    %cst_79 = arith.constant 0.000000e+00 : f32
    %264 = vector.broadcast %cst_79 : f32 to vector<1x32xf32>
    %265 = arith.maximumf %263, %264 : vector<1x32xf32>
    %266 = vector.extract_strided_slice %167 {offsets = [3, 0], sizes = [1, 128], strides = [1, 1]} : vector<4x128xf32> to vector<1x128xf32>
    %267 = arith.truncf %263 : vector<1x32xf32> to vector<1x32xbf16>
    %cst_80 = arith.constant dense<0.000000e+00> : vector<1x128xf32>
    %268 = tpu.matmul %267, %168, %cst_80 {dimension_numbers = #tpu.dot_dimension_numbers<[1], [0], [0], [1], [0, 0, 1, 1], [], []>} : vector<1x32xbf16>, vector<32x128xbf16>, vector<1x128xf32> -> vector<1x128xf32>
    %269 = arith.addf %266, %268 : vector<1x128xf32>
    %270 = vector.extract_strided_slice %269 {offsets = [0, 0], sizes = [1, 32], strides = [1, 1]} : vector<1x128xf32> to vector<1x32xf32>
    %271 = arith.negf %270 : vector<1x32xf32>
    %272 = math.exp %271 : vector<1x32xf32>
    %cst_81 = arith.constant 1.000000e+00 : f32
    %273 = vector.broadcast %cst_81 : f32 to vector<1x32xf32>
    %274 = arith.addf %273, %272 : vector<1x32xf32>
    %275 = arith.divf %273, %274 : vector<1x32xf32>
    %276 = vector.extract_strided_slice %269 {offsets = [0, 32], sizes = [1, 32], strides = [1, 1]} : vector<1x128xf32> to vector<1x32xf32>
    %277 = arith.negf %276 : vector<1x32xf32>
    %278 = math.exp %277 : vector<1x32xf32>
    %cst_82 = arith.constant 1.000000e+00 : f32
    %279 = vector.broadcast %cst_82 : f32 to vector<1x32xf32>
    %280 = arith.addf %279, %278 : vector<1x32xf32>
    %281 = arith.divf %279, %280 : vector<1x32xf32>
    %282 = vector.extract_strided_slice %269 {offsets = [0, 64], sizes = [1, 32], strides = [1, 1]} : vector<1x128xf32> to vector<1x32xf32>
    %283 = math.tanh %282 : vector<1x32xf32>
    %284 = vector.extract_strided_slice %269 {offsets = [0, 96], sizes = [1, 32], strides = [1, 1]} : vector<1x128xf32> to vector<1x32xf32>
    %285 = arith.negf %284 : vector<1x32xf32>
    %286 = math.exp %285 : vector<1x32xf32>
    %cst_83 = arith.constant 1.000000e+00 : f32
    %287 = vector.broadcast %cst_83 : f32 to vector<1x32xf32>
    %288 = arith.addf %287, %286 : vector<1x32xf32>
    %289 = arith.divf %287, %288 : vector<1x32xf32>
    %290 = arith.mulf %281, %261 : vector<1x32xf32>
    %291 = arith.mulf %275, %283 : vector<1x32xf32>
    %292 = arith.addf %290, %291 : vector<1x32xf32>
    %293 = math.tanh %292 : vector<1x32xf32>
    %294 = arith.mulf %289, %293 : vector<1x32xf32>
    %cst_84 = arith.constant 0.000000e+00 : f32
    %295 = vector.broadcast %cst_84 : f32 to vector<1x32xf32>
    %296 = arith.maximumf %294, %295 : vector<1x32xf32>
    %297 = tpu.concatenate %203, %234, %265, %296 in 0 : vector<1x32xf32>, vector<1x32xf32>, vector<1x32xf32>, vector<1x32xf32> -> vector<4x32xf32>
    %c560 = arith.constant 560 : index
    %c0_85 = arith.constant 0 : index
    %298 = vector.load %arg7[%c560, %c0_85] : memref<624x128xbf16, #tpu.memory_space<vmem>>, vector<32x26xbf16>
    %299 = arith.truncf %135 : vector<4x32xf32> to vector<4x32xbf16>
    %cst_86 = arith.constant dense<0.000000e+00> : vector<4x26xf32>
    %300 = tpu.matmul %299, %298, %cst_86 {dimension_numbers = #tpu.dot_dimension_numbers<[1], [0], [0], [1], [0, 0, 1, 1], [], []>} : vector<4x32xbf16>, vector<32x26xbf16>, vector<4x26xf32> -> vector<4x26xf32>
    %c592 = arith.constant 592 : index
    %c0_87 = arith.constant 0 : index
    %301 = vector.load %arg7[%c592, %c0_87] : memref<624x128xbf16, #tpu.memory_space<vmem>>, vector<32x26xbf16>
    %302 = arith.truncf %297 : vector<4x32xf32> to vector<4x32xbf16>
    %cst_88 = arith.constant dense<0.000000e+00> : vector<4x26xf32>
    %303 = tpu.matmul %302, %301, %cst_88 {dimension_numbers = #tpu.dot_dimension_numbers<[1], [0], [0], [1], [0, 0, 1, 1], [], []>} : vector<4x32xbf16>, vector<32x26xbf16>, vector<4x26xf32> -> vector<4x26xf32>
    %304 = arith.addf %300, %303 : vector<4x26xf32>
    %c7 = arith.constant 7 : index
    %c0_89 = arith.constant 0 : index
    %305 = vector.load %arg8[%c7, %c0_89] : memref<8x128xf32, #tpu.memory_space<vmem>>, vector<1x26xf32>
    %306 = vector.broadcast %305 : vector<1x26xf32> to vector<4x26xf32>
    %307 = arith.addf %304, %306 : vector<4x26xf32>
    %c0_90 = arith.constant 0 : index
    %c0_91 = arith.constant 0 : index
    %c0_92 = arith.constant 0 : index
    %308 = vector.load %arg9[%c0_90, %c0_91, %c0_92] : memref<1x4x26xf32, #tpu.memory_space<vmem>>, vector<1x4x26xf32>
    %309 = vector.shape_cast %308 : vector<1x4x26xf32> to vector<4x26xf32>
    %310 = vector.shape_cast %307 : vector<4x26xf32> to vector<1x4x26xf32>
    tpu.vector_store %arg9[%c0_90, %c0_91, %c0_92], %310 {strides = array<i32>} : memref<1x4x26xf32, #tpu.memory_space<vmem>>, vector<1x4x26xf32>,
    %c0_93 = arith.constant 0 : index
    %c0_94 = arith.constant 0 : index
    %c0_95 = arith.constant 0 : index
    %311 = vector.load %arg10[%c0_93, %c0_94, %c0_95] : memref<1x1x32xf32, #tpu.memory_space<vmem>>, vector<1x1x32xf32>
    %312 = vector.shape_cast %311 : vector<1x1x32xf32> to vector<1x32xf32>
    %313 = vector.shape_cast %294 : vector<1x32xf32> to vector<1x1x32xf32>
    tpu.vector_store %arg10[%c0_93, %c0_94, %c0_95], %313 {strides = array<i32>} : memref<1x1x32xf32, #tpu.memory_space<vmem>>, vector<1x1x32xf32>,
    %c0_96 = arith.constant 0 : index
    %c0_97 = arith.constant 0 : index
    %c0_98 = arith.constant 0 : index
    %314 = vector.load %arg11[%c0_96, %c0_97, %c0_98] : memref<1x1x32xf32, #tpu.memory_space<vmem>>, vector<1x1x32xf32>
    %315 = vector.shape_cast %314 : vector<1x1x32xf32> to vector<1x32xf32>
    %316 = vector.shape_cast %292 : vector<1x32xf32> to vector<1x1x32xf32>
    tpu.vector_store %arg11[%c0_96, %c0_97, %c0_98], %316 {strides = array<i32>} : memref<1x1x32xf32, #tpu.memory_space<vmem>>, vector<1x1x32xf32>,
    return
  }
  func.func @transform_0(%arg0: i32, %arg1: memref<2x4xi32, #tpu.memory_space<smem>>) -> (i32, i32, i32) {
    %c0_i32 = arith.constant 0 : i32
    %c0_i32_0 = arith.constant 0 : i32
    %c0_i32_1 = arith.constant 0 : i32
    return %arg0, %c0_i32, %c0_i32_0 : i32, i32, i32
  }
  func.func @transform_1(%arg0: i32, %arg1: memref<2x4xi32, #tpu.memory_space<smem>>) -> (i32, i32, i32) {
    %c0_i32 = arith.constant 0 : i32
    %c0_i32_0 = arith.constant 0 : i32
    %c0_i32_1 = arith.constant 0 : i32
    return %arg0, %c0_i32, %c0_i32_0 : i32, i32, i32
  }
  func.func @transform_2(%arg0: i32, %arg1: memref<2x4xi32, #tpu.memory_space<smem>>) -> (i32, i32, i32) {
    %c0_i32 = arith.constant 0 : i32
    %c0_i32_0 = arith.constant 0 : i32
    %c0_i32_1 = arith.constant 0 : i32
    return %arg0, %c0_i32, %c0_i32_0 : i32, i32, i32
  }
  func.func @transform_3(%arg0: i32, %arg1: memref<2x4xi32, #tpu.memory_space<smem>>) -> (i32, i32, i32) {
    %c0_i32 = arith.constant 0 : i32
    %c0_i32_0 = arith.constant 0 : i32
    %c0_i32_1 = arith.constant 0 : i32
    return %arg0, %c0_i32, %c0_i32_0 : i32, i32, i32
  }
  func.func @transform_4(%arg0: i32, %arg1: memref<2x4xi32, #tpu.memory_space<smem>>) -> (i32, i32, i32) {
    %c0_i32 = arith.constant 0 : i32
    %c0_i32_0 = arith.constant 0 : i32
    %c0_i32_1 = arith.constant 0 : i32
    return %arg0, %c0_i32, %c0_i32_0 : i32, i32, i32
  }
  func.func @transform_5(%arg0: i32, %arg1: memref<2x4xi32, #tpu.memory_space<smem>>) -> (i32, i32) {
    %c0_i32 = arith.constant 0 : i32
    %c0_i32_0 = arith.constant 0 : i32
    %c0_i32_1 = arith.constant 0 : i32
    return %c0_i32, %c0_i32_0 : i32, i32
  }
  func.func @transform_6(%arg0: i32, %arg1: memref<2x4xi32, #tpu.memory_space<smem>>) -> (i32, i32) {
    %c0_i32 = arith.constant 0 : i32
    %c0_i32_0 = arith.constant 0 : i32
    %c0_i32_1 = arith.constant 0 : i32
    return %c0_i32, %c0_i32_0 : i32, i32
  }
  func.func @transform_7(%arg0: i32, %arg1: memref<2x4xi32, #tpu.memory_space<smem>>) -> (i32, i32, i32) {
    %c0_i32 = arith.constant 0 : i32
    %c0_i32_0 = arith.constant 0 : i32
    %c0_i32_1 = arith.constant 0 : i32
    return %arg0, %c0_i32, %c0_i32_0 : i32, i32, i32
  }
  func.func @transform_8(%arg0: i32, %arg1: memref<2x4xi32, #tpu.memory_space<smem>>) -> (i32, i32, i32) {
    %c0_i32 = arith.constant 0 : i32
    %c0_i32_0 = arith.constant 0 : i32
    %c0_i32_1 = arith.constant 0 : i32
    return %arg0, %c0_i32, %c0_i32_0 : i32, i32, i32
  }
  func.func @transform_9(%arg0: i32, %arg1: memref<2x4xi32, #tpu.memory_space<smem>>) -> (i32, i32, i32) {
    %c0_i32 = arith.constant 0 : i32
    %c0_i32_0 = arith.constant 0 : i32
    %c0_i32_1 = arith.constant 0 : i32
    return %arg0, %c0_i32, %c0_i32_0 : i32, i32, i32
  }
}

</mosaic_0001>

<bundles_post_ra>
// kernel: tpu_custom_call.1
= control target key start
LH: loop header
LB: loop body
LE: loop exit
PB: predicated region body
PF: predicated region fallthrough
CT: control target
= control target key end

     0   :  { %s3444_s0 = inlined_call_operand.vmem [shape: s32[2,4], index: 0, kind: input, shape index: {}]   ;;  %s3445_s1 = inlined_call_operand.vmem [shape: f32[2,4,208], index: 1, kind: input, shape index: {}]   ;;  %s3446_s2 = inlined_call_operand.vmem [shape: f32[2,16,1], index: 2, kind: input, shape index: {}]   ;;  %s3447_s3 = inlined_call_operand.vmem [shape: f32[2,16,1], index: 3, kind: input, shape index: {}]   ;;  %s3448_s4 = inlined_call_operand.vmem [shape: f32[2,1,32], index: 4, kind: input, shape index: {}]   ;;  %s3449_s5 = inlined_call_operand.vmem [shape: f32[2,1,32], index: 5, kind: input, shape index: {}]   ;;  %s3450_s6 = inlined_call_operand.hbm [shape: bf16[624,128], index: 6, kind: input, shape index: {}]   ;;  %s3451_s7 = inlined_call_operand.vmem [shape: f32[8,128], index: 7, kind: input, shape index: {}]   ;;  %s3452_s8 = inlined_call_operand.hbm [shape: f32[2,4,26], index: 8, kind: output, shape index: {0}]   ;;  %s3453_s9 = inlined_call_operand.hbm [shape: f32[2,1,32], index: 9, kind: output, shape index: {1}]   ;;  %s3454_s10 = inlined_call_operand.hbm [shape: f32[2,1,32], index: 10, kind: output, shape index: {2}]  }
   0x1   :  { %3458 = sst [smem:[#allocation15_spill]] %s3445_s1  ;;  %s16_s15 = sshll.u32 %s3444_s0, 4  ;;  %s17_s15 = int_to_ptr.vmem [resolvable:$true] %s16_s15 }
   0x2   :  { %3459 = sst [smem:[#allocation16_spill]] %s3446_s2  ;;  %s2672_s16 = scalar_lea.vmem %s17_s15, 32 }
   0x3   :  { %p2673_p0 = scmp.ne.s32.totalorder %s17_s15, %s2672_s16  ;;  %p2677_p1 = scmp.lt.s32.totalorder %s17_s15, %s17_s15 }
   0x4   :  { %p2678_p2 = scmp.lt.s32.totalorder %s2672_s16, %s2672_s16 }
   0x6   :  { %p2679_p3 = por %p2678_p2, %p2677_p1 }
   0x8   :  { %p2680_p4 = pnand %p2679_p3, %p2673_p0 }
   0xa   :  { %2683 = shalt.err (!%p2680_p4)  }
   0xb   :  { %s2834_s17 = smov [#allocation3]  }
   0xc   :  { %19 = dma.vmem_to_smem %s17_s15, 32, %s2834_s17, [#allocation2] }
   0xd   :  { %2804 = dma.done.wait [#allocation2], 32 }
   0xe   :  { %2805 = vsyncadd [#allocation2], 4294967264 }
   0xf   :  { %21 = sfence }
  0x10   :  { %22 = vsyncpa [#allocation5], 0 }
  0x11   :  { %23 = vsyncpa [#allocation6], 0 }
  0x12   :  { %25 = vsyncpa [#allocation6 + $0x1], 0 }
  0x13   :  { %26 = vsyncpa [#allocation9], 0 }
  0x14   :  { %28 = vsyncpa [#allocation9 + $0x1], 0  ;;  %s2905_s18 = smov 0   ;;  %s2907_s0 = smov 0  }
  0x15   :  { %s2909_s19 = smov 0   ;;  %s2911_s20 = smov 0  }
  0x16 LB: > { %s2926_s21 = sadd.s32 4294967295, %s2832_s20   ;;  %s3455_s22 = sadd.s32 4294967294, %s2832_s20   ;;  %s2832_s20 = sphi %s2911_s20, %s3486_s20   ;;  %s2828_s19 = sphi %s2909_s19, %s3485_s19   ;;  %s2824_s0 = sphi %s2907_s0, %s3484_s0   ;;  %s2820_s18 = sphi %s2905_s18, %s3483_s18  }
  0x17   : > { %s2930_s23 = sadd.s32 1, %s2832_s20   ;;  %s213_s24 = sadd.s32 1, %s2828_s19 }
  0x18   : > { %s210_s25 = ssub.s32 %s2832_s20, %s2930_s23  ;;  %p223_p5 = scmp.ne.s32.totalorder %s2828_s19, %s2824_s0 }
  0x19   : > { %p211_p6 = scmp.eq.s32.totalorder %s210_s25, 0  ;;  %p224_p7 = scmp.eq.s32.totalorder %s2926_s21, 1 }
  0x1a   : > { %p229_p8 = scmp.ne.s32.totalorder %s2824_s0, %s2820_s18  ;;  %p230_p9 = scmp.eq.s32.totalorder %s3455_s22, 1 }
  0x1b   : > { %s2943_s26 = scalar_select %p211_p6, %s2828_s19, %s213_s24  }
  0x1c   : > { %p2945_p10 = por %p224_p7, %p223_p5  ;;  %p2949_p11 = por %p230_p9, %p229_p8 }
  0x1d   : > { %p2223_p12 = scmp.ge.s32.totalorder %s2832_s20, 1  ;;  %p289_p13 = scmp.lt.s32.totalorder %s2832_s20, 3 }
  0x1e   : > { %s3461_s28 = scalar_select %p2949_p11, 1, 0 }
  0x1f   : > { %p2522_p0 = scmp.eq.s32.totalorder %s2926_s21, 0  ;;  %p2956_p1 = pnand %p2223_p12, %p289_p13 }
  0x20   : > { %s2835_s30 = smov [#allocation4]  }
  0x21   : > { %s301_s11 = sshll.u32 %s2835_s30, 4  ;;  %p2508_p2 = pneg %p2956_p1  ;;  %s302_s11 = int_to_ptr.vmem [resolvable:$true] %s301_s11 }
  0x22   : > { %s2695_s12 = scalar_lea.vmem %s302_s11, 4992  ;;  %p2703_p8 = scmp.lt.s32.totalorder %s302_s11, %s302_s11 }
  0x23   : > { %p2509_p3 = pnand %p2522_p0, %p2508_p2  ;;  %p2696_p5 = scmp.ne.s32.totalorder %s302_s11, %s2695_s12 }
  0x24   : > { %p2704_p9 = scmp.lt.s32.totalorder %s2695_s12, %s2695_s12 }
  0x25   : > { %p2686_p4 = pneg %p2509_p3 }
  0x26   : > { %p2705_p11 = por %p2704_p9, %p2703_p8 }
  0x27   : > { %p2698_p6 = pnand %p2696_p5, %p2686_p4 }
  0x29   : > { %p2699_p7 = pneg %p2698_p6 }
  0x2b   : > { %p2706_p12 = pnand %p2705_p11, %p2699_p7 }
  0x2d   : > { %2709 = shalt.err (!%p2706_p12)
}
  0x2e   : > { %s2836_s13 = smov 64   ;;  %s2837_s14 = smov 4  }
  0x2f   : > { %2511 = dma.hbm_to_vmem [thread:$0]  (!%p2509_p3), %s3450_s6, 4992, %s302_s11, [#allocation5], %s2836_s13, %s2836_s13, %s2837_s14  }
  0x30   : > { %356 = sbr.rel (%p2956_p1) target bundleno = 4073 (0xfe9), region = 48 }
  0x35   : > { %2807 = dma.done.wait (%p2522_p0), [#allocation5], 4992  }
  0x36   : > { %2809 = vsyncadd (%p2522_p0), [#allocation5], 4294962304  ;;  %p416_p13 = scmp.lt.s32.totalorder %s2926_s21, 1  ;;  %v2838_v0 = vmov 0   ;;  %s3463_s2 = sld [smem:[#allocation16_spill]]  ;;  %v2569_v4 = vld [vmem:[#allocation4 + $0x38] sm:$0xff]   ;;  %v456_v20 = vlaneseq }
  0x37   : > { %2567 = vset.pattern.permute.xlu0 %v2838_v0  ;;  %2568 = vset.pattern.permute.xlu1 %v2838_v0  ;;  %v2570_v6 = vld [vmem:[#allocation4 + $0x30] sm:$0xff]   ;;  %v2571_v9 = vld [vmem:[#allocation4 + $0x28] sm:$0xff]   ;;  %v2572_v10 = vld [vmem:[#allocation4 + $0x20] sm:$0xff]   ;;  %s3464_s1 = sld [smem:[#allocation15_spill]]  ;;  %vm869_vm12 = vcmask 654336   ;;  %s2841_s12 = smov 32  }
  0x38   : > { %s2977_s17 = scalar_select %p416_p13, %s2926_s21, 1  ;;  %882 = vmatprep.subr.bf16.mxu0 %v2838_v0  ;;  %v2573_v11 = vld [vmem:[#allocation4 + $0x18] sm:$0xff]   ;;  %v2574_v12 = vld [vmem:[#allocation4 + $0x10] sm:$0xff]   ;;  %v2575_v13 = vld [vmem:[#allocation4 + $0x8] sm:$0xff]   ;;  %v3003_v21 = vshrl.u32 %v456_v20, 7 }
  0x39   : > { %883 = vmatpush1.bf16.msra.mxu0 %v2569_v4  ;;  %v2576_v14 = vld [vmem:[#allocation4] sm:$0xff]   ;;  %v2578_v16 = vld [vmem:[#allocation4 + $0x58] sm:$0xff]   ;;  %v2579_v17 = vld [vmem:[#allocation4 + $0x50] sm:$0xff]   ;;  %s2844_s22 = smov [#allocation8]  }
  0x3a   : > { %s2331_s24 = sshll.u32 %s2977_s17, 4  ;;  %884 = vmatprep.subr.bf16.mxu0 %v2838_v0  ;;  %v2577_v15 = vld [vmem:[#allocation4 + $0x60] sm:$0xff]   ;;  %v2580_v18 = vld [vmem:[#allocation4 + $0x48] sm:$0xff]   ;;  %s2330_s14 = sshll.u32 %s2977_s17, 3  ;;  %v3009_v22 = vsub.s32 0, %v3003_v21  ;;  %v462_v24 = vsub.s32 4, %v3003_v21 }
  0x3b   : > { %s430_s13 = scalar_lea.vmem %s3447_s3, %s2331_s24  ;;  %v2581_v19 = vld [vmem:[#allocation4 + $0x40] sm:$0xff]   ;;  %v3014_v26 = vsub.s32 1, %v3003_v21  ;;  %v542_v27 = vsub.s32 5, %v3003_v21  ;;  %v610_v30 = vsub.s32 6, %v3003_v21  ;;  %v3026_v35 = vsub.s32 2, %v3003_v21  ;;  %s433_s25 = scalar_lea.vmem %s3448_s4, %s2977_s17 }
  0x3c   : > { %s425_s30 = scalar_lea.vmem %s3463_s2, %s2331_s24  ;;  %v441_v7 = vld [vmem:[%s430_s13] sm:$0xff]  ;;  %v442_v8 = vld [vmem:[%s430_s13 + $0x8] sm:$0xff]  ;;  %v678_v39 = vsub.s32 7, %v3003_v21  ;;  %v3034_v40 = vsub.s32 3, %v3003_v21  ;;  %s436_s11 = scalar_lea.vmem %s3449_s5, %s2977_s17 }
  0x3d   : > { %v439_v1 = vld [vmem:[%s425_s30] sm:$0xff]  ;;  %v440_v2 = vld [vmem:[%s425_s30 + $0x8] sm:$0xff]  ;;  %885 = vmatpush1.bf16.msra.mxu0 %v2570_v6  ;;  %s420_s24 = scalar_lea.vmem %s3464_s1, %s2330_s14  ;;  %s2297_s13 = sshll.u32 %s2926_s21, 7 }
  0x3e   : > { %447 = vperm.xlu0 %2567, %v439_v1   ;;  %vm443_vm0 = vcmp.gt.f32.partialorder %v439_v1, 1e-05  ;;  %vm444_vm1 = vcmp.gt.f32.partialorder %v440_v2, 1e-05  ;;  %886 = vmatprep.subr.bf16.mxu0 %v2838_v0  ;;  %v438_v23 = vld [vmem:[%s420_s24] sm:$0xff]  ;;  %s1445_s14 = sadd.s32 1, %s2297_s13 }
  0x3f   : > { %v499_v3 = vsel %vm443_vm0, 1, %v2838_v0  ;;  %v500_v5 = vsel %vm444_vm1, 1, %v2838_v0  ;;  %v459_v25 = vrot.slane %v438_v23, %v3009_v22  ;;  %v463_v28 = vrot.slane %v438_v23, %v462_v24  ;;  %s1440_s15 = sld [smem:[#allocation3 + %s2297_s13]]  ;;  %s1451_s17 = sadd.s32 2, %s2297_s13 }
  0x40   : > { %502 = vperm.xlu1 %2568, %v499_v3   ;;  %v539_v31 = vrot.slane %v438_v23, %v3014_v26  ;;  %v543_v32 = vrot.slane %v438_v23, %v542_v27  ;;  %v611_v37 = vrot.slane %v438_v23, %v610_v30  ;;  %vm498_vm2 = vcmp.gt.f32.partialorder %v438_v23, 1e-05  ;;  %s1446_s16 = sld [smem:[#allocation3 + %s1445_s14]]  ;;  %s2714_s1 = sshll.u32 %s2844_s22, 4  ;;  %s2715_s1 = int_to_ptr.vmem [resolvable:$false] %s2714_s1 }
  0x41   : > { %887 = vmatpush1.bf16.msra.mxu0 %v2571_v9  ;;  %v469_v29 = vrot.slane %v459_v25, %v3009_v22  ;;  %v473_v34 = vrot.slane %v463_v28, %v3009_v22  ;;  %v607_v45 = vrot.slane %v438_v23, %v3026_v35  ;;  %v3046_v50 = vsel %vm498_vm2, 1, %v2838_v0  ;;  %s1452_s24 = sld [smem:[#allocation3 + %s1451_s17]] }
  0x42   : > { %452 = vperm.xlu0 %2567, %v440_v2   ;;  %888 = vmatprep.subr.bf16.mxu0 %v2838_v0  ;;  %v549_v38 = vrot.slane %v539_v31, %v3014_v26  ;;  %v553_v42 = vrot.slane %v543_v32, %v3014_v26  ;;  %v621_v47 = vrot.slane %v611_v37, %v3026_v35 }
  0x43   : > { %v679_v51 = vrot.slane %v438_v23, %v678_v39  ;;  %v675_v53 = vrot.slane %v438_v23, %v3034_v40  ;;  %v617_v58 = vrot.slane %v607_v45, %v3026_v35  ;;  %v3054_v59 = vrot.slane %v3046_v50, %v462_v24 }
  0x44   : > { %505 = vperm.xlu1 %2568, %v500_v5   ;;  %v513_v60 = vrot.slane %v3046_v50, %v3009_v22 }
  0x45   : > { %889 = vmatpush1.bf16.msra.mxu0 %v2572_v10  ;;  %v689_v1 = vrot.slane %v679_v51, %v3034_v40  ;;  %v3062_v3 = vrot.slane %v675_v53, %v3034_v40  ;;  %v525_v10 = vrot.slane %v3054_v59, %v3009_v22  ;;  %v585_v51 = vrot.slane %v3046_v50, %v542_v27 }
  0x46   : > { %777 = vperm.xlu0 %2567, %v441_v7   ;;  %890 = vmatprep.subr.bf16.mxu0 %v2838_v0 }
  0x47   : > { %vm3084_vm3 = vcmp.eq.s32.totalorder %v525_v10, 1  ;;  %v653_v10 = vrot.slane %v3046_v50, %v610_v30 }
  0x48   : > { %782 = vperm.xlu1 %2568, %v442_v8  }
  0x49   : > { %891 = vmatpush1.bf16.msra.mxu0 %v2573_v11  ;;  %v3068_v11 = vrot.slane %v513_v60, %v3009_v22 }
  0x4a   : > { %892 = vmatprep.subr.bf16.mxu0 %v2838_v0 }
  0x4b   : > { %vm526_vm5 = vcmp.eq.s32.totalorder %v3068_v11, 1 }
  0x4d   : > { %893 = vmatpush1.bf16.msra.mxu0 %v2574_v12 }
  0x4e   : > { %894 = vmatprep.subr.bf16.mxu0 %v2838_v0 }
  0x51   : > { %895 = vmatpush1.bf16.msra.mxu0 %v2575_v13 }
  0x52   : > { %896 = vmatprep.subr.bf16.mxu0 %v2838_v0 }
  0x55   : > { %897 = vmatpush1.bf16.msra.mxu0 %v2576_v14 }
  0x56   : > { %904 = vmatprep.subr.bf16.mxu0 %v2838_v0 }
  0x59   : > { %905 = vmatpush2.bf16.msra.mxu0 %v2577_v15 }
  0x5a   : > { %906 = vmatprep.subr.bf16.mxu0 %v2838_v0 }
  0x5d   : > { %907 = vmatpush2.bf16.msra.mxu0 %v2578_v16 }
  0x5e   : > { %908 = vmatprep.subr.bf16.mxu0 %v2838_v0 }
  0x61   : > { %909 = vmatpush2.bf16.msra.mxu0 %v2579_v17 }
  0x62   : > { %910 = vmatprep.subr.bf16.mxu0 %v2838_v0 }
  0x65   : > { %911 = vmatpush2.bf16.msra.mxu0 %v2580_v18 }
  0x66   : > { %912 = vmatprep.subr.bf16.mxu0 %v2838_v0 }
  0x69   : > { %913 = vmatpush2.bf16.msra.mxu0 %v2581_v19 }
  0xb9   : > { %v3022_v33 = vpop.permute.xlu0 %447 }
  0xba   : > { %v474_v36 = vsub.f32 %v3022_v33, %v469_v29  ;;  %v475_v44 = vsub.f32 %v3022_v33, %v473_v34  ;;  %v554_v48 = vsub.f32 %v3022_v33, %v549_v38  ;;  %v555_v55 = vsub.f32 %v3022_v33, %v553_v42 }
  0xbb   : > { %v623_v61 = vsub.f32 %v3022_v33, %v621_v47  ;;  %v691_v17 = vsub.f32 %v3022_v33, %v689_v1  ;;  %v622_v22 = vsub.f32 %v3022_v33, %v617_v58  ;;  %v690_v27 = vsub.f32 %v3022_v33, %v3062_v3 }
  0xbc   : > { %v478_v41 = vmul.f32 10.0, %v474_v36  ;;  %v479_v57 = vmul.f32 10.0, %v475_v44  ;;  %v558_v62 = vmul.f32 10.0, %v554_v48  ;;  %v559_v5 = vmul.f32 10.0, %v555_v55 }
  0xbd   : > { %v3037_v43 = vpop.permute.xlu0 %452  ;;  %v627_v13 = vmul.f32 10.0, %v623_v61 }
  0xbe   : > { %v476_v46 = vsub.f32 %v3037_v43, %v469_v29  ;;  %v556_v49 = vsub.f32 %v3037_v43, %v549_v38  ;;  %v482_v52 = vand.u32 2147483647, %v478_v41  ;;  %v477_v0 = vsub.f32 %v3037_v43, %v473_v34 }
  0xbf   : > { %v624_v4 = vsub.f32 %v3037_v43, %v617_v58  ;;  %v483_v9 = vand.u32 2147483647, %v479_v57  ;;  %v557_v12 = vsub.f32 %v3037_v43, %v553_v42  ;;  %v562_v14 = vand.u32 2147483647, %v558_v62  ;;  %v3078_v58 = vpop.permute.xlu1 %502 }
  0xc0   : > { %v480_v54 = vmul.f32 10.0, %v476_v46  ;;  %v560_v56 = vmul.f32 10.0, %v556_v49  ;;  %v486_v2 = vsub.f32 0.0, %v482_v52  ;;  %v481_v8 = vmul.f32 10.0, %v477_v0 }
  0xc1   : > { %v628_v19 = vmul.f32 10.0, %v624_v4  ;;  %v487_v23 = vsub.f32 0.0, %v483_v9  ;;  %v561_v24 = vmul.f32 10.0, %v557_v12  ;;  %v563_v29 = vand.u32 2147483647, %v559_v5  ;;  %v778_v9 = vpop.permute.xlu0 %777 }
  0xc2   : > { %v484_v63 = vand.u32 2147483647, %v480_v54  ;;  %v564_v7 = vand.u32 2147483647, %v560_v56  ;;  %v485_v16 = vand.u32 2147483647, %v481_v8  ;;  %v625_v31 = vsub.f32 %v3037_v43, %v621_v47 }
  0xc3   : > { %v490_v18 = vmul.f32 1.442695, %v486_v2  ;;  %v492_v32 = vmul.f32 1.442695, %v487_v23  ;;  %v565_v34 = vand.u32 2147483647, %v561_v24  ;;  %v693_v45 = vsub.f32 %v3037_v43, %v689_v1  ;;  %v3093_v8 = vpop.permute.xlu1 %505 }
  0xc4   : > { %v488_v6 = vsub.f32 0.0, %v484_v63  ;;  %v568_v25 = vsub.f32 0.0, %v564_v7  ;;  %v489_v28 = vsub.f32 0.0, %v485_v16  ;;  %v631_v36 = vand.u32 2147483647, %v627_v13 }
  0xc5   : > { %v567_v38 = vsub.f32 0.0, %v563_v29  ;;  %v629_v41 = vmul.f32 10.0, %v625_v31  ;;  %v569_v42 = vsub.f32 0.0, %v565_v34  ;;  %v695_v49 = vmul.f32 10.0, %v691_v17 }
  0xc6   : > { %v494_v15 = vmul.f32 1.442695, %v488_v6  ;;  %v496_v37 = vmul.f32 1.442695, %v489_v28  ;;  %v635_v44 = vsub.f32 0.0, %v631_v36  ;;  %v697_v52 = vmul.f32 10.0, %v693_v45 }
  0xc7   : > { %v572_v46 = vmul.f32 1.442695, %v567_v38  ;;  %v633_v48 = vand.u32 2147483647, %v629_v41  ;;  %v576_v47 = vmul.f32 1.442695, %v569_v42  ;;  %v692_v60 = vsub.f32 %v3037_v43, %v3062_v3 }
  0xc8   : > { %2608 = vpow2.f32 %v494_v15  ;;  %v566_v53 = vsub.f32 0.0, %v562_v14  ;;  %v626_v54 = vmul.f32 10.0, %v622_v22  ;;  %v574_v56 = vmul.f32 1.442695, %v568_v25 }
  0xc9   : > { %2610 = vpow2.f32 %v492_v32  ;;  %v637_v55 = vsub.f32 0.0, %v633_v48  ;;  %v632_v57 = vand.u32 2147483647, %v628_v19  ;;  %v701_v59 = vand.u32 2147483647, %v697_v52 }
  0xca   : > { %2612 = vpow2.f32 %v496_v37  ;;  %v640_v61 = vmul.f32 1.442695, %v635_v44  ;;  %v699_v63 = vand.u32 2147483647, %v695_v49  ;;  %v593_v1 = vrot.slane %v585_v51, %v3014_v26 }
  0xcb   : > { %2614 = vpow2.f32 %v490_v18  ;;  %v644_v62 = vmul.f32 1.442695, %v637_v55  ;;  %v570_v2 = vmul.f32 1.442695, %v566_v53  ;;  %v630_v4 = vand.u32 2147483647, %v626_v54 }
  0xcc   : > { %2616 = vpow2.f32 %v572_v46  ;;  %v705_v5 = vsub.f32 0.0, %v701_v59  ;;  %v636_v6 = vsub.f32 0.0, %v632_v57  ;;  %vm507_vm4 = vcmp.eq.s32.totalorder %v3078_v58, 1  ;;  %v2235_v58 = vld [vmem:[%s3451_s7] ss:$0 sm:$0xff] }
  0xcd   : > { %2618 = vpow2.f32 %v576_v47  ;;  %v581_v43 = vrot.slane %v3046_v50, %v3014_v26  ;;  %v696_v7 = vmul.f32 10.0, %v692_v60  ;;  %v703_v33 = vsub.f32 0.0, %v699_v63  ;;  %vm3107_vm8 = vmand %vm507_vm4, %vm3084_vm3 }
  0xce   : > { %2620 = vpow2.f32 %v644_v62  ;;  %v694_v3 = vmul.f32 10.0, %v690_v27  ;;  %vm3095_vm6 = vcmp.eq.s32.totalorder %v593_v1, 1  ;;  %v634_v12 = vsub.f32 0.0, %v630_v4  ;;  %vm3115_vm9 = vmand %vm507_vm4, %vm526_vm5 }
  0xcf   : > { %2622 = vpow2.f32 %v574_v56  ;;  %vm508_vm7 = vcmp.eq.s32.totalorder %v3093_v8, 1  ;;  %v712_v14 = vmul.f32 1.442695, %v705_v5  ;;  %v642_v16 = vmul.f32 1.442695, %v636_v6  ;;  %vm3123_vm10 = vmand %vm507_vm4, %vm3095_vm6  ;;  %v783_v8 = vpop.permute.xlu1 %782 }
  0xd0   : > { %2624 = vpow2.f32 %v640_v61  ;;  %v700_v18 = vand.u32 2147483647, %v696_v7  ;;  %v589_v23 = vrot.slane %v581_v43, %v3014_v26  ;;  %v708_v24 = vmul.f32 1.442695, %v703_v33  ;;  %vm531_vm11 = vmand %vm508_vm7, %vm3084_vm3  ;;  %v2583_v33 = vld [vmem:[#allocation4 + $0x68] sm:$0xff]  }
  0xd1   : > { %2626 = vpow2.f32 %v570_v2  ;;  %v698_v28 = vand.u32 2147483647, %v694_v3  ;;  %v661_v29 = vrot.slane %v653_v10, %v3026_v35  ;;  %v638_v22 = vmul.f32 1.442695, %v634_v12  ;;  %vm3139_vm13 = vmand %vm508_vm7, %vm526_vm5  ;;  %v2584_v3 = vld [vmem:[#allocation4 + $0x90] sm:$0xff]  }
  0xd2   : > { %2628 = vpow2.f32 %v712_v14  ;;  %v649_v38 = vrot.slane %v3046_v50, %v3026_v35  ;;  %v704_v42 = vsub.f32 0.0, %v700_v18  ;;  %vm599_vm14 = vmand %vm508_vm7, %vm3095_vm6  ;;  %vm594_vm15 = vcmp.eq.s32.totalorder %v589_v23, 1  ;;  %v2265_v14 = vld [vmem:[%s3451_s7 + $0x1] ss:$0 sm:$0xff] }
  0xd3   : > { %2630 = vpow2.f32 %v642_v16  ;;  %vm2250_vm0 = vmpackc.low %vm3139_vm13, %vm3115_vm9  ;;  %vm663_vm1 = vcmp.eq.s32.totalorder %v661_v29, 1  ;;  %v721_v46 = vrot.slane %v3046_v50, %v678_v39  ;;  %v702_v48 = vsub.f32 0.0, %v698_v28 }
  0xd4   : > { %2632 = vpow2.f32 %v708_v24  ;;  %vm3162_vm2 = vmand %vm507_vm4, %vm594_vm15  ;;  %v710_v53 = vmul.f32 1.442695, %v704_v42  ;;  %v657_v21 = vrot.slane %v649_v38, %v3026_v35  ;;  %v717_v61 = vrot.slane %v3046_v50, %v3034_v40 }
  0xd5   : > { %v2609_v15 = vpop.eup %2608  ;;  %2634 = vpow2.f32 %v638_v22  ;;  %vm665_vm3 = vmand %vm507_vm4, %vm663_vm1  ;;  %v729_v54 = vrot.slane %v721_v46, %v3034_v40  ;;  %v706_v55 = vmul.f32 1.442695, %v702_v48  ;;  %v789_v10 = vmul.f32 %v2235_v58, %v778_v9 }
  0xd6   : > { %v2611_v17 = vpop.eup %2610  ;;  %vm667_vm5 = vmand %vm508_vm7, %vm663_vm1  ;;  %2636 = vpow2.f32 %v710_v53  ;;  %v725_v0 = vrot.slane %v717_v61, %v3034_v40  ;;  %v2582_v40 = vld [vmem:[#allocation4 + $0x70] sm:$0xff]   ;;  %v790_v16 = vmul.f32 %v2235_v58, %v783_v8 }
  0xd7   : > { %v2613_v25 = vpop.eup %2612  ;;  %v533_v32 = vsel %vm3107_vm8, %v2611_v17, 0.0  ;;  %vm598_vm6 = vmand %vm508_vm7, %vm594_vm15  ;;  %vm662_vm8 = vcmp.eq.s32.totalorder %v657_v21, 1  ;;  %2638 = vpow2.f32 %v706_v55  ;;  %2382 = vmatprep.subr.bf16.mxu1 %v2582_v40 }
  0xd8   : > { %v2615_v31 = vpop.eup %2614  ;;  %v535_v34 = vsel %vm531_vm11, %v2613_v25, 0.0  ;;  %vm2254_vm9 = vmpackc.low %vm598_vm6, %vm3162_vm2  ;;  %vm730_vm1 = vcmp.eq.s32.totalorder %v725_v0, 1  ;;  %2383 = vmatpush3.bf16.msra.mxu1 %v2582_v40  ;;  %v2587_v0 = vld [vmem:[#allocation4 + $0x78] sm:$0xff]   ;;  %vm1234_vm6 = vcmask 1040384  }
  0xd9   : > { %v2617_v36 = vpop.eup %2616  ;;  %v767_v37 = vpack.c.bf16 %v535_v34, %v533_v32  ;;  %v2251_v44 = vpack.c.bf16 %v2609_v15, %v2615_v31  ;;  %vm664_vm11 = vmand %vm507_vm4, %vm662_vm8  ;;  %2384 = vmatprep.subr.bf16.mxu1 %v2583_v33 }
  0xda   : > { %v2619_v41 = vpop.eup %2618  ;;  %v601_v11 = vsel %vm3123_vm10, %v2617_v36, 0.0  ;;  %vm731_vm10 = vcmp.eq.s32.totalorder %v729_v54, 1  ;;  %vm666_vm15 = vmand %vm508_vm7, %vm662_vm8  ;;  %vm1236_vm8 = vcmask 1041408  }
  0xdb   : > { %2249 = vmatprep.mubr.msk.bf16.mxu0 %vm869_vm12, %v767_v37  ;;  %v603_v45 = vsel %vm599_vm14, %v2619_v41, 0.0  ;;  %v2621_v47 = vpop.eup %2620  ;;  %vm733_vm13 = vmand %vm507_vm4, %vm731_vm10 }
  0xdc   : > { %2252 = vmatmul.mubr.msk.bf16.vlgmr.msra.gmra.mxu0 %vm2250_vm0, %v2251_v44  ;;  %v769_v49 = vpack.c.bf16 %v603_v45, %v601_v11  ;;  %v2623_v52 = vpop.eup %2622  ;;  %v671_v56 = vsel %vm667_vm5, %v2621_v47, 0.0  ;;  %vm735_vm14 = vmand %vm508_vm7, %vm731_vm10  ;;  %2385 = vmatpush3.bf16.msra.mxu1 %v2583_v33 }
  0xdd   : > { %v2625_v39 = vpop.eup %2624  ;;  %vm2258_vm0 = vmpackc.low %vm666_vm15, %vm664_vm11  ;;  %2394 = vmatprep.subr.bf16.mxu1 %v2584_v3  ;;  %vm2001_vm15 = vcmask 257027  }
  0xde   : > { %2253 = vmatprep.mubr.msk.bf16.mxu0 %vm869_vm12, %v769_v49  ;;  %v2627_v57 = vpop.eup %2626  ;;  %v669_v60 = vsel %vm665_vm3, %v2625_v39, 0.0  ;;  %vm732_vm2 = vmand %vm507_vm4, %vm730_vm1  ;;  %vm993_vm4 = vcmask 261120  }
  0xdf   : > { %v2255_v59 = vpack.c.bf16 %v2623_v52, %v2627_v57  ;;  %v771_v35 = vpack.c.bf16 %v671_v56, %v669_v60  ;;  %v2629_v62 = vpop.eup %2628  ;;  %vm734_vm3 = vmand %vm508_vm7, %vm730_vm1  ;;  %vm1120_vm7 = vcmask 523264  }
  0xe0   : > { %v2631_v63 = vpop.eup %2630  ;;  %v739_v50 = vsel %vm735_vm14, %v2629_v62, 0.0  ;;  %vm2262_vm5 = vmpackc.low %vm734_vm3, %vm732_vm2 }
  0xe1   : > { %v2633_v27 = vpop.eup %2632 }
  0xe2   : > { %v2635_v1 = vpop.eup %2634  ;;  %v737_v4 = vsel %vm733_vm13, %v2633_v27, 0.0  ;;  %v2585_v27 = vld [vmem:[#allocation4 + $0x88] sm:$0xff]  }
  0xe3   : > { %v2259_v2 = vpack.c.bf16 %v2631_v63, %v2635_v1  ;;  %v773_v5 = vpack.c.bf16 %v739_v50, %v737_v4  ;;  %v2637_v6 = vpop.eup %2636  ;;  %v2586_v50 = vld [vmem:[#allocation4 + $0x80] sm:$0xff]  }
  0xe4   : > { %2256 = vmatmul.mubr.msk.bf16.gmra.mxu0 %vm2254_vm9, %v2255_v59  ;;  %v2639_v43 = vpop.eup %2638  ;;  %v2266_v4 = vld [vmem:[%s3451_s7 + $0x2] ss:$0 sm:$0xff]  ;;  %vm1238_vm9 = vcmask 1042432  }
  0xe5   : > { %2257 = vmatprep.mubr.msk.bf16.mxu0 %vm869_vm12, %v771_v35  ;;  %v2263_v7 = vpack.c.bf16 %v2637_v6, %v2639_v43 }
  0xec   : > { %2260 = vmatmul.mubr.msk.bf16.gmra.mxu0 %vm2258_vm0, %v2259_v2 }
  0xed   : > { %2261 = vmatprep.mubr.msk.bf16.mxu0 %vm869_vm12, %v773_v5  ;;  %vm2840_vm12 = vmmov 0  }
  0xf4   : > { %2264 = vmatmul.mubr.msk.bf16.gmra.mxu0 %vm2262_vm5, %v2263_v7 }
 0x19c   : > { %v916_v12 = vpop.f32.mrf.mxu0 }
 0x19d   : > { %v917_v13 = vadd.f32 %v916_v12, %v789_v10 }
 0x19e   : > { %v918_v15 = vpop.f32.mrf.mxu0 }
 0x19f   : > { %v952_v17 = vadd.f32 %v2265_v14, %v917_v13 }
 0x1a0   : > { %v919_v30 = vpop.f32.mrf.mxu0 }
 0x1a1   : > { %v920_v18 = vadd.f32 %v919_v30, %v790_v16  ;;  %v960_v25 = vmax.f32 %v952_v17, 0.0 }
 0x1a2   : > { %v921_v19 = vpop.f32.mrf.mxu0 }
 0x1a3   : > { %v953_v23 = vadd.f32 %v2265_v14, %v920_v18 }
 0x1a4   : > { %v924_v24 = vpop.f32.mrf.mxu0 }
 0x1a5   : > { %v961_v28 = vmax.f32 %v953_v23, 0.0  ;;  %v925_v29 = vadd.f32 %v924_v24, %v789_v10 }
 0x1a6   : > { %v926_v31 = vpop.f32.mrf.mxu0 }
 0x1a7   : > { %v972_v22 = vpack.c.bf16 %v961_v28, %v960_v25  ;;  %v954_v34 = vadd.f32 %v2265_v14, %v925_v29 }
 0x1a8   : > { %v927_v32 = vpop.f32.mrf.mxu0 }
 0x1a9   : > { %v928_v26 = vadd.f32 %v927_v32, %v790_v16  ;;  %2386 = vmatprep.mubr.msk.bf16.mxu1 %vm993_vm4, %v972_v22  ;;  %v962_v41 = vmax.f32 %v954_v34, 0.0  ;;  %v2588_v22 = vld [vmem:[#allocation4 + $0xd0] sm:$0xff]   ;;  %v2839_v32 = vmov 0.0   ;;  %v2589_v34 = vld [vmem:[#allocation4 + $0xc8] sm:$0xff]  }
 0x1aa   : > { %v929_v36 = vpop.f32.mrf.mxu0  ;;  %2450 = vmatprep.subr.bf16.mxu0 %v2839_v32  ;;  %2454 = vmatprep.mubr.msk.bf16.mxu0 %vm2840_vm12, %v2839_v32 }
 0x1ab   : > { %v955_v37 = vadd.f32 %v2265_v14, %v928_v26  ;;  %v2590_v26 = vld [vmem:[#allocation4 + $0xc0] sm:$0xff]   ;;  %v2591_v36 = vld [vmem:[#allocation4 + $0xb8] sm:$0xff]  }
 0x1ac   : > { %v932_v38 = vpop.f32.mrf.mxu0 }
 0x1ad   : > { %v963_v42 = vmax.f32 %v955_v37, 0.0  ;;  %v933_v44 = vadd.f32 %v932_v38, %v789_v10  ;;  %v2592_v37 = vld [vmem:[#allocation4 + $0xb0] sm:$0xff]   ;;  %v2593_v38 = vld [vmem:[#allocation4 + $0xa8] sm:$0xff]  }
 0x1ae   : > { %v934_v11 = vpop.f32.mrf.mxu0 }
 0x1af   : > { %v973_v45 = vpack.c.bf16 %v963_v42, %v962_v41  ;;  %v956_v48 = vadd.f32 %v2265_v14, %v933_v44  ;;  %v3225_v41 = vld [vmem:[#allocation4 + $0x110] sm:$0xff]   ;;  %v2594_v42 = vld [vmem:[#allocation4 + $0xa0] sm:$0xff]   ;;  %v2595_v44 = vld [vmem:[#allocation4 + $0x98] sm:$0xff]  }
 0x1b0   : > { %v935_v46 = vpop.f32.mrf.mxu0  ;;  %2451 = vmatpush3.bf16.msra.mxu0 %v3225_v41 }
 0x1b1   : > { %v936_v49 = vadd.f32 %v935_v46, %v790_v16  ;;  %2387 = vmatmul.mubr.msk.bf16.vlgmr.msra.gmra.mxu1 %vm993_vm4, %v973_v45  ;;  %v964_v53 = vmax.f32 %v956_v48, 0.0  ;;  %2452 = vmatprep.subr.bf16.mxu0 %v2839_v32  ;;  %v2273_v48 = vld [vmem:[%s3451_s7 + $0x3] ss:$0 sm:$0xff] }
 0x1b2   : > { %v937_v47 = vpop.f32.mrf.mxu0  ;;  %2395 = vmatpush3.bf16.msra.mxu1 %v2584_v3 }
 0x1b3   : > { %v957_v51 = vadd.f32 %v2265_v14, %v936_v49  ;;  %2396 = vmatprep.subr.bf16.mxu1 %v2585_v27 }
 0x1b4   : > { %v940_v52 = vpop.f32.mrf.mxu0 }
 0x1b5   : > { %v965_v21 = vmax.f32 %v957_v51, 0.0  ;;  %v941_v39 = vadd.f32 %v940_v52, %v789_v10 }
 0x1b6   : > { %v942_v54 = vpop.f32.mrf.mxu0  ;;  %2397 = vmatpush3.bf16.msra.mxu1 %v2585_v27 }
 0x1b7   : > { %v974_v55 = vpack.c.bf16 %v965_v21, %v964_v53  ;;  %v958_v57 = vadd.f32 %v2265_v14, %v941_v39  ;;  %2398 = vmatprep.subr.bf16.mxu1 %v2586_v50 }
 0x1b8   : > { %v943_v56 = vpop.f32.mrf.mxu0 }
 0x1b9   : > { %v944_v59 = vadd.f32 %v943_v56, %v790_v16  ;;  %2390 = vmatprep.mubr.msk.bf16.mxu1 %vm993_vm4, %v974_v55  ;;  %v966_v61 = vmax.f32 %v958_v57, 0.0 }
 0x1ba   : > { %v945_v60 = vpop.f32.mrf.mxu0  ;;  %2399 = vmatpush3.bf16.msra.mxu1 %v2586_v50 }
 0x1bb   : > { %v959_v35 = vadd.f32 %v2265_v14, %v944_v59  ;;  %2400 = vmatprep.subr.bf16.mxu1 %v2587_v0 }
 0x1bd   : > { %v967_v62 = vmax.f32 %v959_v35, 0.0 }
 0x1be   : > { %2401 = vmatpush3.bf16.msra.mxu1 %v2587_v0 }
 0x1bf   : > { %v975_v63 = vpack.c.bf16 %v967_v62, %v966_v61  ;;  %2410 = vmatprep.subr.bf16.mxu1 %v2839_v32 }
 0x1c1   : > { %2391 = vmatmul.mubr.msk.bf16.gmra.mxu1 %vm993_vm4, %v975_v63 }
 0x271   : > { %v2388_v1 = vpop.f32.mrf.mxu1 }
 0x272   : > { %v1049_v7 = vadd.f32 %v2388_v1, %v2266_v4 }
 0x273   : > { %v1040_v2 = vpop.f32.mrf.mxu1 }
 0x274   : > { %v1041_v6 = vadd.f32 %v2266_v4, %v1040_v2  ;;  %v1073_v10 = vmax.f32 %v1049_v7, 0.0 }
 0x275   : > { %v2389_v5 = vpop.f32.mrf.mxu1 }
 0x276   : > { %v1052_v43 = vadd.f32 %v2389_v5, %v2266_v4  ;;  %v1071_v58 = vmax.f32 %v1041_v6, 0.0 }
 0x277   : > { %v1043_v40 = vpop.f32.mrf.mxu1 }
 0x278   : > { %v1044_v33 = vadd.f32 %v2266_v4, %v1043_v40  ;;  %v1074_v3 = vmax.f32 %v1052_v43, 0.0 }
 0x27a   : > { %v1072_v9 = vmax.f32 %v1044_v33, 0.0  ;;  %v1088_v12 = vpack.c.bf16 %v1074_v3, %v1073_v10 }
 0x27c   : > { %v1087_v8 = vpack.c.bf16 %v1072_v9, %v1071_v58 }
 0x27e   : > { %2402 = vmatprep.mubr.msk.bf16.mxu1 %vm1120_vm7, %v1087_v8 }
 0x27f   : > { %2403 = vmatmul.mubr.msk.bf16.vlgmr.msra.gmra.mxu1 %vm1120_vm7, %v1088_v12 }
 0x280   : > { %2411 = vmatpush3.bf16.msra.mxu1 %v2588_v22 }
 0x281   : > { %v2392_v13 = vpop.f32.mrf.mxu1  ;;  %2412 = vmatprep.subr.bf16.mxu1 %v2839_v32 }
 0x282   : > { %v1065_v17 = vadd.f32 %v2392_v13, %v2266_v4 }
 0x283   : > { %v1056_v14 = vpop.f32.mrf.mxu1 }
 0x284   : > { %v1057_v16 = vadd.f32 %v2266_v4, %v1056_v14  ;;  %v1077_v28 = vmax.f32 %v1065_v17, 0.0  ;;  %2413 = vmatpush3.bf16.msra.mxu1 %v2589_v34 }
 0x285   : > { %v2393_v15 = vpop.f32.mrf.mxu1  ;;  %2414 = vmatprep.subr.bf16.mxu1 %v2839_v32 }
 0x286   : > { %v1068_v30 = vadd.f32 %v2393_v15, %v2266_v4  ;;  %v1075_v24 = vmax.f32 %v1057_v16, 0.0 }
 0x287   : > { %v1059_v18 = vpop.f32.mrf.mxu1 }
 0x288   : > { %v1060_v19 = vadd.f32 %v2266_v4, %v1059_v18  ;;  %v1078_v23 = vmax.f32 %v1068_v30, 0.0  ;;  %2415 = vmatpush3.bf16.msra.mxu1 %v2590_v26 }
 0x289   : > { %2416 = vmatprep.subr.bf16.mxu1 %v2839_v32 }
 0x28a   : > { %v1076_v25 = vmax.f32 %v1060_v19, 0.0  ;;  %v1090_v31 = vpack.c.bf16 %v1078_v23, %v1077_v28 }
 0x28c   : > { %v1089_v29 = vpack.c.bf16 %v1076_v25, %v1075_v24  ;;  %2417 = vmatpush3.bf16.msra.mxu1 %v2591_v36  ;;  %v2597_v36 = vld [vmem:[#allocation4 + $0xf0] sm:$0xff]  }
 0x28d   : > { %2418 = vmatprep.subr.bf16.mxu1 %v2839_v32 }
 0x28e   : > { %2406 = vmatprep.mubr.msk.bf16.mxu1 %vm1120_vm7, %v1089_v29 }
 0x28f   : > { %2407 = vmatmul.mubr.msk.bf16.gmra.mxu1 %vm1120_vm7, %v1090_v31 }
 0x290   : > { %2419 = vmatpush3.bf16.msra.mxu1 %v2592_v37  ;;  %2426 = vmatprep.mubr.msk.bf16.mxu1 %vm2840_vm12, %v2839_v32 }
 0x291   : > { %2420 = vmatprep.subr.bf16.mxu1 %v2839_v32 }
 0x294   : > { %2421 = vmatpush3.bf16.msra.mxu1 %v2593_v38  ;;  %v2598_v38 = vld [vmem:[#allocation4 + $0xe8] sm:$0xff]  }
 0x295   : > { %2422 = vmatprep.subr.bf16.mxu1 %v2839_v32 }
 0x298   : > { %2423 = vmatpush3.bf16.msra.mxu1 %v2594_v42  ;;  %v2599_v42 = vld [vmem:[#allocation4 + $0xe0] sm:$0xff]  }
 0x299   : > { %2424 = vmatprep.subr.bf16.mxu1 %v2839_v32 }
 0x29c   : > { %2425 = vmatpush3.bf16.msra.mxu1 %v2595_v44  ;;  %v3243_v44 = vld [vmem:[#allocation4 + $0x108] sm:$0xff]  }
 0x29d   : > { %2430 = vmatprep.subr.bf16.mxu1 %v2839_v32  ;;  %2453 = vmatpush3.bf16.msra.mxu0 %v3243_v44 }
 0x29e   : > { %2466 = vmatprep.subr.bf16.mxu0 %v2839_v32 }
 0x33f   : > { %v2404_v11 = vpop.f32.mrf.mxu1 }
 0x340   : > { %v1176_v53 = vadd.f32 %v2404_v11, %v2273_v48  ;;  %v2601_v11 = vld [vmem:[#allocation4 + $0xd8] sm:$0xff]  }
 0x341   : > { %v1167_v45 = vpop.f32.mrf.mxu1 }
 0x342   : > { %v1168_v49 = vadd.f32 %v2273_v48, %v1167_v45  ;;  %v1200_v55 = vmax.f32 %v1176_v53, 0.0  ;;  %v1531_v45 = vld [vmem:[%s433_s25] sm:$0x1]  ;;  %s1457_s25 = sadd.s32 3, %s2297_s13  ;;  %v2282_v53 = vld [vmem:[%s3451_s7 + $0x4] ss:$0 sm:$0xff] }
 0x343   : > { %v2405_v46 = vpop.f32.mrf.mxu1  ;;  %s1458_s29 = sld [smem:[#allocation3 + %s1457_s25]]  ;;  %s3342_s25 = sand.u32 1, %s2824_s0  }
 0x344   : > { %v1179_v47 = vadd.f32 %v2405_v46, %v2273_v48  ;;  %v1198_v39 = vmax.f32 %v1168_v49, 0.0  ;;  %v1533_v46 = vpack.c.bf16 %v1531_v45, %v1531_v45  ;;  %v1438_v49 = vand.u32 127, %v456_v20  ;;  %s3456_s30 = scalar_lea.vmem [#allocation10], %s3342_s25 }
 0x345   : > { %v1170_v51 = vpop.f32.mrf.mxu1 }
 0x346   : > { %v1171_v52 = vadd.f32 %v2273_v48, %v1170_v51  ;;  %v1201_v54 = vmax.f32 %v1179_v47, 0.0  ;;  %2455 = vmatmul.mubr.msk.bf16.vlgmr.msra.gmra.mxu0 %vm993_vm4, %v1533_v46  ;;  %v1441_v47 = vstv %s1440_s15  ;;  %v1447_v51 = vstv %s1446_s16  ;;  %s2842_s15 = smov 64  }
 0x347   : > { %2467 = vmatpush3.bf16.msra.mxu0 %v3225_v41  ;;  %2470 = vmatprep.mubr.msk.bf16.mxu0 %vm2840_vm12, %v2839_v32  ;;  %vm1442_vm10 = vcmp.eq.s32.totalorder %v1438_v49, %v1441_v47  ;;  %vm1448_vm11 = vcmp.eq.s32.totalorder %v1438_v49, %v1447_v51 }
 0x348   : > { %v1199_v21 = vmax.f32 %v1171_v52, 0.0  ;;  %v1213_v57 = vmax.f32 %v1200_v55, %v1201_v54  ;;  %2468 = vmatprep.subr.bf16.mxu0 %v2839_v32  ;;  %v1453_v52 = vstv %s1452_s24  ;;  %s2843_s24 = smov 96  }
 0x349   : > { %vm1454_vm13 = vcmp.eq.s32.totalorder %v1438_v49, %v1453_v52  ;;  %v1459_v54 = vstv %s1458_s29  ;;  %s409_s29 = scalar_lea.vmem [#allocation8], %s3342_s25 }
 0x34a   : > { %v1206_v56 = vmax.f32 %v1198_v39, %v1199_v21  ;;  %v1214_v35 = vrot.slane %v1213_v57, 4  ;;  %v2298_v21 = vsel %vm1442_vm10, 1.0, %v2839_v32  ;;  %v2299_v39 = vsel %vm1448_vm11, 1.0, %v2839_v32  ;;  %s2043_s16 = sshll.u32 %s409_s29, 4  ;;  %s2044_s16 = int_to_ptr.vmem [resolvable:$true] %s2043_s16 }
 0x34b   : > { %2469 = vmatpush3.bf16.msra.mxu0 %v3243_v44  ;;  %v2300_v20 = vsel %vm1454_vm13, 1.0, %v2839_v32  ;;  %vm1460_vm14 = vcmp.eq.s32.totalorder %v1438_v49, %v1459_v54  ;;  %p2717_p2 = scmp.lt.s32.totalorder %s2044_s16, %s2715_s1 }
 0x34c   : > { %v1207_v59 = vrot.slane %v1206_v56, 4  ;;  %v1215_v1 = vmax.f32 %v1213_v57, %v1214_v35  ;;  %2482 = vmatprep.subr.bf16.mxu0 %v2839_v32 }
 0x34e   : > { %v1208_v63 = vmax.f32 %v1206_v56, %v1207_v59  ;;  %v1216_v3 = vrot.slane %v1215_v1, 2  ;;  %v1463_v59 = vsel %vm1234_vm6, %v2298_v21, %v2299_v39 }
 0x34f   : > { %v2408_v60 = vpop.f32.mrf.mxu1 }
 0x350   : > { %v1192_v62 = vadd.f32 %v2408_v60, %v2273_v48  ;;  %v1209_v43 = vrot.slane %v1208_v63, 2  ;;  %v1217_v13 = vmax.f32 %v1215_v1, %v1216_v3 }
 0x351   : > { %v1183_v61 = vpop.f32.mrf.mxu1 }
 0x352   : > { %v1184_v50 = vadd.f32 %v2273_v48, %v1183_v61  ;;  %v1204_v4 = vmax.f32 %v1192_v62, 0.0  ;;  %v1210_v10 = vmax.f32 %v1208_v63, %v1209_v43  ;;  %v1218_v18 = vrot.slane %v1217_v13, 1  ;;  %v2602_v61 = vld [vmem:[#allocation4 + $0x100] sm:$0xff]  }
 0x353   : > { %v2409_v27 = vpop.f32.mrf.mxu1  ;;  %v2301_v63 = vsel %vm1460_vm14, 1.0, %v2839_v32 }
 0x354   : > { %v1195_v0 = vadd.f32 %v2409_v27, %v2273_v48  ;;  %v1202_v7 = vmax.f32 %v1184_v50, 0.0  ;;  %v1211_v16 = vrot.slane %v1210_v10, 1  ;;  %v1219_v28 = vmax.f32 %v1217_v13, %v1218_v18 }
 0x355   : > { %v1186_v2 = vpop.f32.mrf.mxu1  ;;  %v1464_v27 = vsel %vm1236_vm8, %v1463_v59, %v2300_v20 }
 0x356   : > { %v1205_v5 = vmax.f32 %v1195_v0, 0.0  ;;  %v1187_v6 = vadd.f32 %v2273_v48, %v1186_v2  ;;  %v1212_v23 = vmax.f32 %v1210_v10, %v1211_v16  ;;  %v2310_v48 = vld [vmem:[%s436_s11] ss:$0 sm:$0xff]  ;;  %v2603_v0 = vld [vmem:[#allocation4 + $0xf8] sm:$0xff]   ;;  %v1465_v1 = vsel %vm1238_vm9, %v1464_v27, %v2301_v63  ;;  %s3457_s11 = sshll.u32 %s2926_s21, 4 }
 0x357   : > { %1602 = vrot.lane.b32.xlu1 %v2310_v48, %s2841_s12  ;;  %v1466_v2 = vpack.c.bf16 %v1465_v1, %v1465_v1 }
 0x358   : > { %v1227_v40 = vmax.f32 %v1204_v4, %v1205_v5  ;;  %v1203_v33 = vmax.f32 %v1187_v6, 0.0  ;;  %v1235_v31 = vsel %vm1234_vm6, %v1212_v23, %v1219_v28 }
 0x35a   : > { %v1228_v58 = vrot.slane %v1227_v40, 4  ;;  %v1220_v9 = vmax.f32 %v1202_v7, %v1203_v33 }
 0x35c   : > { %v1229_v8 = vmax.f32 %v1227_v40, %v1228_v58  ;;  %v1221_v12 = vrot.slane %v1220_v9, 4  ;;  %v2302_v58 = vld [vmem:[%s3451_s7 + $0x6] ss:$0 sm:$0xff] }
 0x35e   : > { %v1230_v14 = vrot.slane %v1229_v8, 2  ;;  %v1222_v15 = vmax.f32 %v1220_v9, %v1221_v12 }
 0x360   : > { %v1231_v30 = vmax.f32 %v1229_v8, %v1230_v14  ;;  %v1223_v17 = vrot.slane %v1222_v15, 2 }
 0x362   : > { %v1224_v19 = vmax.f32 %v1222_v15, %v1223_v17  ;;  %v1232_v24 = vrot.slane %v1231_v30, 1 }
 0x364   : > { %v1225_v25 = vrot.slane %v1224_v19, 1  ;;  %v1233_v22 = vmax.f32 %v1231_v30, %v1232_v24 }
 0x366   : > { %v1226_v29 = vmax.f32 %v1224_v19, %v1225_v25 }
 0x368   : > { %v1237_v34 = vsel %vm1236_vm8, %v1235_v31, %v1226_v29 }
 0x369   : > { %v1239_v26 = vsel %vm1238_vm9, %v1237_v34, %v1233_v22 }
 0x36a   : > { %v1256_v37 = vpack.c.bf16 %v1239_v26, %v1239_v26 }
 0x36c   : > { %2427 = vmatmul.mubr.bf16.vlgmr.msra.gmra.mxu1 %v1256_v37 }
 0x36d   : > { %2431 = vmatpush3.bf16.msra.mxu1 %v2597_v36  ;;  %2438 = vmatprep.mubr.msk.bf16.mxu1 %vm2840_vm12, %v2839_v32 }
 0x36e   : > { %2432 = vmatprep.subr.bf16.mxu1 %v2839_v32 }
 0x371   : > { %2433 = vmatpush3.bf16.msra.mxu1 %v2598_v38 }
 0x372   : > { %2434 = vmatprep.subr.bf16.mxu1 %v2839_v32 }
 0x375   : > { %2435 = vmatpush3.bf16.msra.mxu1 %v2599_v42 }
 0x376   : > { %2436 = vmatprep.subr.bf16.mxu1 %v2839_v32 }
 0x379   : > { %2437 = vmatpush3.bf16.msra.mxu1 %v2601_v11 }
 0x37a   : > { %2442 = vmatprep.subr.bf16.mxu1 %v2839_v32 }
 0x3c9   : > { %v1603_v24 = vpop.permute.xlu1 %1602 }
 0x406   : > { %v1583_v4 = vpop.f32.mrf.mxu0 }
 0x408   : > { %v2456_v5 = vpop.f32.mrf.mxu0 }
 0x40a   : > { %v1586_v6 = vpop.f32.mrf.mxu0 }
 0x40c   : > { %v2457_v43 = vpop.f32.mrf.mxu0 }
 0x42c   : > { %v1344_v55 = vpop.f32.mrf.mxu1 }
 0x42d   : > { %v1345_v56 = vadd.f32 %v2282_v53, %v1344_v55 }
 0x42e   : > { %v2428_v57 = vpop.f32.mrf.mxu1 }
 0x42f   : > { %v1350_v60 = vmax.f32 %v1345_v56, 0.0 }
 0x430   : > { %v1347_v35 = vpop.f32.mrf.mxu1 }
 0x431   : > { %v1359_v62 = vpack.c.bf16 %v1350_v60, %v1350_v60 }
 0x432   : > { %v2429_v50 = vpop.f32.mrf.mxu1 }
 0x433   : > { %2439 = vmatmul.mubr.msk.bf16.vlgmr.msra.gmra.mxu1 %vm1120_vm7, %v1359_v62 }
 0x434   : > { %2443 = vmatpush3.bf16.msra.mxu1 %v2602_v61  ;;  %2446 = vmatprep.mubr.msk.bf16.mxu1 %vm2840_vm12, %v2839_v32 }
 0x435   : > { %2444 = vmatprep.subr.bf16.mxu1 %v2839_v32 }
 0x438   : > { %2445 = vmatpush3.bf16.msra.mxu1 %v2603_v0 }
 0x439   : > { %2458 = vmatprep.subr.bf16.mxu1 %v2839_v32 }
 0x43b   : > { %2447 = vmatmul.mubr.msk.bf16.vlgmr.msra.gmra.mxu1 %vm993_vm4, %v1466_v2 }
 0x43c   : > { %2459 = vmatpush3.bf16.msra.mxu1 %v3225_v41  ;;  %2462 = vmatprep.mubr.msk.bf16.mxu1 %vm2840_vm12, %v2839_v32 }
 0x43d   : > { %2460 = vmatprep.subr.bf16.mxu1 %v2839_v32 }
 0x440   : > { %2461 = vmatpush3.bf16.msra.mxu1 %v3243_v44 }
 0x441   : > { %2474 = vmatprep.subr.bf16.mxu1 %v2839_v32 }
 0x4f3   : > { %v3288_v7 = vpop.f32.mrf.mxu1 }
 0x4f5   : > { %v2440_v40 = vpop.f32.mrf.mxu1 }
 0x4f7   : > { %v1429_v33 = vpop.f32.mrf.mxu1 }
 0x4f9   : > { %v2441_v3 = vpop.f32.mrf.mxu1 }
 0x4fb   : > { %v1521_v9 = vpop.f32.mrf.mxu1 }
 0x4fc   : > { %v3293_v10 = vadd.f32 %v2302_v58, %v1521_v9 }
 0x4fd   : > { %v2448_v8 = vpop.f32.mrf.mxu1 }
 0x4fe   : > { %v1589_v12 = vadd.f32 %v1583_v4, %v3293_v10 }
 0x4ff   : > { %v1524_v13 = vpop.f32.mrf.mxu1 }
 0x500   : > { %2640 = vtanh.f32 %v1589_v12  ;;  %v2309_v16 = vmul.f32 -1.442695, %v1589_v12 }
 0x501   : > { %v2449_v14 = vpop.f32.mrf.mxu1 }
 0x502   : > { %2642 = vpow2.f32 %v2309_v16 }
 0x50d   : > { %v2641_v15 = vpop.eup %2640 }
 0x50e   : > { %1607 = vrot.lane.b32.xlu0 %v2641_v15, %s2842_s15 }
 0x50f   : > { %v2643_v30 = vpop.eup %2642 }
 0x510   : > { %v1593_v17 = vadd.f32 1.0, %v2643_v30 }
 0x512   : > { %2644 = vrcp.f32 %v1593_v17 }
 0x51f   : > { %v2645_v18 = vpop.eup %2644 }
 0x520   : > { %v1605_v25 = vmul.f32 %v2645_v18, %v1603_v24 }
 0x580   : > { %v1608_v19 = vpop.permute.xlu0 %1607 }
 0x581   : > { %v1610_v23 = vmul.f32 %v2645_v18, %v1608_v19  ;;  %v2291_v19 = vld [vmem:[%s3451_s7 + $0x5] ss:$0 sm:$0xff] }
 0x582   : > { %v1427_v24 = vadd.f32 %v2291_v19, %v3288_v7 }
 0x583   : > { %1612 = vrot.lane.b32.xlu0 %v1610_v23, %s2841_s12  ;;  %v2604_v23 = vld [vmem:[#allocation4 + $0x120] sm:$0xff]  }
 0x5f5   : > { %v1613_v28 = vpop.permute.xlu0 %1612 }
 0x5f6   : > { %v1615_v29 = vadd.f32 %v1613_v28, %v1605_v25  ;;  %v2605_v28 = vld [vmem:[#allocation4 + $0x118] sm:$0xff]  }
 0x5f8   : > { %2646 = vtanh.f32 %v1615_v29  ;;  %v1682_v53 = vrot.slane %v1615_v29, 7  ;;  %v1432_v29 = vmax.f32 %v1427_v24, 0.0 }
 0x605   : > { %v2647_v31 = vpop.eup %2646 }
 0x606   : > { %1618 = vrot.lane.b32.xlu1 %v2647_v31, %s2842_s15  ;;  %v1870_v31 = vpack.c.bf16 %v1432_v29, %v1432_v29 }
 0x678   : > { %v1619_v22 = vpop.permute.xlu1 %1618 }
 0x679   : > { %v1621_v34 = vmul.f32 %v2645_v18, %v1619_v22 }
 0x67b   : > { %v1623_v26 = vpack.c.bf16 %v1621_v34, %v1621_v34  ;;  %v1622_v20 = vmax.f32 %v1621_v34, 0.0 }
 0x67d   : > { %1625 = vrot.lane.b32.xlu0 %v1623_v26, %s2841_s12 }
 0x6ef   : > { %v1626_v36 = vpop.permute.xlu0 %1625 }
 0x6f0   : > { %2463 = vmatmul.mubr.msk.bf16.vlgmr.msra.gmra.mxu1 %vm993_vm4, %v1626_v36 }
 0x6f1   : > { %2475 = vmatpush3.bf16.msra.mxu1 %v3225_v41  ;;  %2478 = vmatprep.mubr.msk.bf16.mxu1 %vm2840_vm12, %v2839_v32 }
 0x6f2   : > { %2476 = vmatprep.subr.bf16.mxu1 %v2839_v32 }
 0x6f5   : > { %2477 = vmatpush3.bf16.msra.mxu1 %v3243_v44 }
 0x6f6   : > { %2490 = vmatprep.subr.bf16.mxu1 %v2839_v32 }
 0x7b0   : > { %v1664_v37 = vpop.f32.mrf.mxu1 }
 0x7b1   : > { %v1671_v38 = vrot.slane %v1664_v37, 7 }
 0x7b2   : > { %v2464_v42 = vpop.f32.mrf.mxu1 }
 0x7b3   : > { %v1673_v11 = vadd.f32 %v1671_v38, %v3293_v10 }
 0x7b4   : > { %v1667_v45 = vpop.f32.mrf.mxu1 }
 0x7b5   : > { %2648 = vtanh.f32 %v1673_v11  ;;  %v2312_v41 = vmul.f32 -1.442695, %v1673_v11 }
 0x7b6   : > { %v2465_v46 = vpop.f32.mrf.mxu1 }
 0x7b7   : > { %2650 = vpow2.f32 %v2312_v41 }
 0x7c2   : > { %v2649_v48 = vpop.eup %2648 }
 0x7c3   : > { %1686 = vrot.lane.b32.xlu1 %v2649_v48, %s2842_s15 }
 0x7c4   : > { %v2651_v49 = vpop.eup %2650 }
 0x7c5   : > { %v1677_v47 = vadd.f32 1.0, %v2651_v49 }
 0x7c7   : > { %2652 = vrcp.f32 %v1677_v47 }
 0x7d4   : > { %v2653_v51 = vpop.eup %2652 }
 0x7d5   : > { %v1684_v21 = vmul.f32 %v2653_v51, %v1682_v53 }
 0x835   : > { %v1687_v44 = vpop.permute.xlu1 %1686 }
 0x836   : > { %v1689_v52 = vmul.f32 %v2653_v51, %v1687_v44 }
 0x838   : > { %1691 = vrot.lane.b32.xlu0 %v1689_v52, %s2841_s12 }
 0x8aa   : > { %v1692_v39 = vpop.permute.xlu0 %1691 }
 0x8ab   : > { %v1694_v54 = vadd.f32 %v1692_v39, %v1684_v21  ;;  %v2606_v39 = vld [vmem:[#allocation4 + $0x130] sm:$0xff]  }
 0x8ad   : > { %2654 = vtanh.f32 %v1694_v54  ;;  %v1763_v58 = vrot.slane %v1694_v54, 7 }
 0x8ba   : > { %v2655_v55 = vpop.eup %2654 }
 0x8bb   : > { %1697 = vrot.lane.b32.xlu1 %v2655_v55, %s2842_s15  ;;  %v2607_v55 = vld [vmem:[#allocation4 + $0x128] sm:$0xff]  }
 0x92d   : > { %v1698_v56 = vpop.permute.xlu1 %1697 }
 0x92e   : > { %v1700_v57 = vmul.f32 %v2653_v51, %v1698_v56 }
 0x930   : > { %v1701_v59 = vmax.f32 %v1700_v57, 0.0  ;;  %v1702_v60 = vpack.c.bf16 %v1700_v57, %v1700_v57 }
 0x932   : > { %v1704_v35 = vshrl.u32 %v1702_v60, 16  ;;  %v1863_v61 = vsel %vm1234_vm6, %v1622_v20, %v1701_v59 }
 0x934   : > { %1706 = vrot.lane.b32.xlu0 %v1704_v35, %s2841_s12 }
 0x9a6   : > { %v1707_v62 = vpop.permute.xlu0 %1706 }
 0x9a7   : > { %2471 = vmatmul.mubr.msk.bf16.vlgmr.msra.gmra.mxu0 %vm993_vm4, %v1707_v62 }
 0x9a8   : > { %2486 = vmatprep.mubr.msk.bf16.mxu0 %vm2840_vm12, %v2839_v32  ;;  %2483 = vmatpush3.bf16.msra.mxu0 %v2606_v39 }
 0x9a9   : > { %2484 = vmatprep.subr.bf16.mxu0 %v2839_v32 }
 0x9ac   : > { %2485 = vmatpush3.bf16.msra.mxu0 %v2607_v55 }
 0xa67   : > { %v1745_v63 = vpop.f32.mrf.mxu0 }
 0xa68   : > { %v1752_v27 = vrot.slane %v1745_v63, 6 }
 0xa69   : > { %v2472_v50 = vpop.f32.mrf.mxu0 }
 0xa6a   : > { %v1754_v0 = vadd.f32 %v1752_v27, %v3293_v10 }
 0xa6b   : > { %v1748_v1 = vpop.f32.mrf.mxu0 }
 0xa6c   : > { %2656 = vtanh.f32 %v1754_v0  ;;  %v2314_v5 = vmul.f32 -1.442695, %v1754_v0 }
 0xa6d   : > { %v2473_v2 = vpop.f32.mrf.mxu0 }
 0xa6e   : > { %2658 = vpow2.f32 %v2314_v5 }
 0xa79   : > { %v2657_v4 = vpop.eup %2656 }
 0xa7a   : > { %1767 = vrot.lane.b32.xlu1 %v2657_v4, %s2842_s15 }
 0xa7b   : > { %v2659_v6 = vpop.eup %2658 }
 0xa7c   : > { %v1758_v43 = vadd.f32 1.0, %v2659_v6 }
 0xa7e   : > { %2660 = vrcp.f32 %v1758_v43 }
 0xa8b   : > { %v2661_v40 = vpop.eup %2660 }
 0xa8c   : > { %v1765_v9 = vmul.f32 %v2661_v40, %v1763_v58 }
 0xaec   : > { %v1768_v33 = vpop.permute.xlu1 %1767 }
 0xaed   : > { %v1770_v3 = vmul.f32 %v2661_v40, %v1768_v33 }
 0xaef   : > { %1772 = vrot.lane.b32.xlu0 %v1770_v3, %s2841_s12 }
 0xb61   : > { %v1773_v8 = vpop.permute.xlu0 %1772 }
 0xb62   : > { %v1775_v12 = vadd.f32 %v1773_v8, %v1765_v9 }
 0xb64   : > { %2662 = vtanh.f32 %v1775_v12 }
 0xb71   : > { %v2663_v13 = vpop.eup %2662 }
 0xb72   : > { %1778 = vrot.lane.b32.xlu1 %v2663_v13, %s2842_s15 }
 0xbe4   : > { %v1779_v14 = vpop.permute.xlu1 %1778 }
 0xbe5   : > { %v1781_v15 = vmul.f32 %v2661_v40, %v1779_v14 }
 0xbe7   : > { %v1782_v16 = vmax.f32 %v1781_v15, 0.0  ;;  %v1783_v30 = vpack.c.bf16 %v1781_v15, %v1781_v15 }
 0xbe9   : > { %v1785_v17 = vrot.slane %v1783_v30, 1  ;;  %v1864_v18 = vsel %vm1236_vm8, %v1863_v61, %v1782_v16 }
 0xbeb   : > { %1786 = vrot.lane.b32.xlu0 %v1785_v17, %s2841_s12 }
 0xc5d   : > { %v1787_v25 = vpop.permute.xlu0 %1786 }
 0xc5e   : > { %2479 = vmatmul.mubr.msk.bf16.vlgmr.msra.gmra.mxu1 %vm993_vm4, %v1787_v25 }
 0xc5f   : > { %2491 = vmatpush3.bf16.msra.mxu1 %v2604_v23  ;;  %2494 = vmatprep.mubr.msk.bf16.mxu1 %vm2840_vm12, %v2839_v32 }
 0xc60   : > { %2492 = vmatprep.subr.bf16.mxu1 %v2839_v32 }
 0xc63   : > { %2493 = vmatpush3.bf16.msra.mxu1 %v2605_v28 }
 0xc66   : > { %2495 = vmatmul.mubr.msk.bf16.vlgmr.msra.gmra.mxu1 %vm993_vm4, %v1870_v31 }
 0xd1e   : > { %v1825_v22 = vpop.f32.mrf.mxu1 }
 0xd1f   : > { %v1832_v34 = vrot.slane %v1825_v22, 5 }
 0xd20   : > { %v2480_v26 = vpop.f32.mrf.mxu1 }
 0xd21   : > { %v1834_v7 = vadd.f32 %v1832_v34, %v3293_v10  ;;  %v1843_v10 = vrot.slane %v1775_v12, 7 }
 0xd22   : > { %v1828_v36 = vpop.f32.mrf.mxu1 }
 0xd23   : > { %2664 = vtanh.f32 %v1834_v7  ;;  %v2316_v48 = vmul.f32 -1.442695, %v1834_v7 }
 0xd24   : > { %v2481_v37 = vpop.f32.mrf.mxu1 }
 0xd25   : > { %2666 = vpow2.f32 %v2316_v48 }
 0xd26   : > { %v3332_v38 = vpop.f32.mrf.mxu1 }
 0xd28   : > { %v2496_v42 = vpop.f32.mrf.mxu1 }
 0xd2a   : > { %v1986_v11 = vpop.f32.mrf.mxu1 }
 0xd2c   : > { %v2497_v45 = vpop.f32.mrf.mxu1 }
 0xd30   : > { %v2665_v46 = vpop.eup %2664 }
 0xd31   : > { %1847 = vrot.lane.b32.xlu1 %v2665_v46, %s2842_s15 }
 0xd32   : > { %v2667_v41 = vpop.eup %2666 }
 0xd33   : > { %v1838_v49 = vadd.f32 1.0, %v2667_v41 }
 0xd35   : > { %2668 = vrcp.f32 %v1838_v49 }
 0xd42   : > { %v2669_v47 = vpop.eup %2668 }
 0xd43   : > { %v1845_v52 = vmul.f32 %v2669_v47, %v1843_v10 }
 0xda3   : > { %v1848_v51 = vpop.permute.xlu1 %1847 }
 0xda4   : > { %v1850_v44 = vmul.f32 %v2669_v47, %v1848_v51 }
 0xda6   : > { %1852 = vrot.lane.b32.xlu0 %v1850_v44, %s2841_s12 }
 0xe18   : > { %v1853_v53 = vpop.permute.xlu0 %1852 }
 0xe19   : > { %v1855_v21 = vadd.f32 %v1853_v53, %v1845_v52 }
 0xe1b   : > { %2670 = vtanh.f32 %v1855_v21 }
 0xe28   : > { %v2671_v54 = vpop.eup %2670 }
 0xe29   : > { %1858 = vrot.lane.b32.xlu1 %v2671_v54, %s2842_s15  ;;  %s2041_s15 = scalar_lea.hbm %s3453_s9, %s3457_s11 }
 0xe9b   : > { %v1859_v56 = vpop.permute.xlu1 %1858 }
 0xe9c   : > { %v1861_v57 = vmul.f32 %v2669_v47, %v1859_v56 }
 0xe9e   : > { %v1862_v20 = vmax.f32 %v1861_v57, 0.0  ;;  %1998 = vrot.lane.b32.xlu1 %v1861_v57, %s2841_s12 }
 0xea0   : > { %v1865_v59 = vsel %vm1238_vm9, %v1864_v18, %v1862_v20 }
 0xea1   : > { %v1875_v60 = vpack.c.bf16 %v1865_v59, %v1865_v59 }
 0xea3   : > { %1877 = vrot.lane.b32.xlu0 %v1875_v60, %s2841_s12  ;;  %s2013_s12 = sand.u32 1, %s2926_s21  }
 0xea4   : > { %s3356_s17 = scalar_lea.sflag [#allocation9], %s2013_s12 }
 0xea7   : > { %2004 = vrot.lane.b32.xlu0 %v1855_v21, %s2843_s24  ;;  %s2710_s24 = scalar_lea.vmem %s2044_s16, 16 }
 0xea8   : > { %p2711_p11 = scmp.ne.s32.totalorder %s2044_s16, %s2710_s24 }
 0xeaa   : > { %p2712_p0 = pnand %p2711_p11, %p2945_p10 }
 0xeac   : > { %p2713_p1 = pneg %p2712_p0 }
 0xf10   : > { %v1999_v32 = vpop.permute.xlu1 %1998 }
 0xf11   : > { %2002 = vst.msk [vmem:[%s409_s29 - $0x3] sm:$0x8] %vm2001_vm15, %v1999_v32 }
 0xf15   : > { %v1878_v35 = vpop.permute.xlu0 %1877 }
 0xf16   : > { %2487 = vmatmul.mubr.msk.bf16.vlgmr.msra.gmra.mxu0 %vm993_vm4, %v1878_v35 }
 0xf19   : > { %v2005_v61 = vpop.permute.xlu0 %2004 }
 0xf1a   : > { %2007 = vst.msk [vmem:[%s3456_s30 - $0x3] sm:$0x8] %vm2001_vm15, %v2005_v61  ;;  %s2716_s30 = scalar_lea.vmem %s2715_s1, 32 }
 0xf1b   : > { %p2718_p3 = scmp.lt.s32.totalorder %s2716_s30, %s2710_s24 }
 0xf1d   : > { %p2719_p4 = por %p2718_p3, %p2717_p2 }
 0xf1f   : > { %p2720_p5 = pnand %p2719_p4, %p2713_p1 }
 0xf21   : > { %2723 = shalt.err (!%p2720_p5)
}
 0xf22   : > { %s2724_s13 = scalar_lea.hbm %s2041_s15, 16  ;;  %s2728_s14 = scalar_lea.hbm %s3453_s9, 32 }
 0xf23   : > { %p2725_p6 = scmp.ne.s32.totalorder %s2041_s15, %s2724_s13  ;;  %p2729_p9 = scmp.lt.s32.totalorder %s2041_s15, %s3453_s9 }
 0xf24   : > { %p2730_p12 = scmp.lt.s32.totalorder %s2728_s14, %s2724_s13 }
 0xf25   : > { %p2726_p7 = pnand %p2725_p6, %p2945_p10 }
 0xf26   : > { %p2731_p13 = por %p2730_p12, %p2729_p9 }
 0xf27   : > { %p2727_p8 = pneg %p2726_p7 }
 0xf29   : > { %p2732_p11 = pnand %p2731_p13, %p2727_p8 }
 0xf2b   : > { %2735 = shalt.err (!%p2732_p11)
}
 0xf2c   : > { %2503 = dma.vmem_to_hbm [thread:$0]  (%p2945_p10), %s2044_s16, 16, %s2041_s15, %s3356_s17  }
 0xf2d   : > { %s3479_s1 = scalar_lea.vmem [#allocation10], %s3342_s25  ;;  %s3480_s30 = sshll.u32 %s2926_s21, 4 }
 0xf2e   : > { %s2056_s22 = sshll.u32 %s3479_s1, 4  ;;  %s2054_s12 = scalar_lea.hbm %s3454_s10, %s3480_s30  ;;  %s2057_s22 = int_to_ptr.vmem [resolvable:$true] %s2056_s22 }
 0xf2f   : > { %s2736_s2 = scalar_lea.vmem %s2057_s22, 16  ;;  %s2845_s11 = smov [#allocation10]  }
 0xf30   : > { %p2737_p0 = scmp.ne.s32.totalorder %s2057_s22, %s2736_s2  ;;  %s2740_s13 = sshll.u32 %s2845_s11, 4  ;;  %s2741_s13 = int_to_ptr.vmem [resolvable:$false] %s2740_s13 }
 0xf31   : > { %s2742_s14 = scalar_lea.vmem %s2741_s13, 32  ;;  %p2743_p3 = scmp.lt.s32.totalorder %s2057_s22, %s2741_s13 }
 0xf32   : > { %p2738_p1 = pnand %p2737_p0, %p2945_p10  ;;  %p2744_p4 = scmp.lt.s32.totalorder %s2742_s14, %s2736_s2 }
 0xf34   : > { %p2739_p2 = pneg %p2738_p1  ;;  %p2745_p5 = por %p2744_p4, %p2743_p3 }
 0xf36   : > { %p2746_p6 = pnand %p2745_p5, %p2739_p2 }
 0xf38   : > { %2749 = shalt.err (!%p2746_p6)
}
 0xf39   : > { %s2750_s15 = scalar_lea.hbm %s2054_s12, 16  ;;  %s2754_s30 = scalar_lea.hbm %s3454_s10, 32 }
 0xf3a   : > { %p2751_p7 = scmp.ne.s32.totalorder %s2054_s12, %s2750_s15  ;;  %p2755_p12 = scmp.lt.s32.totalorder %s2054_s12, %s3454_s10 }
 0xf3b   : > { %p2756_p13 = scmp.lt.s32.totalorder %s2754_s30, %s2750_s15 }
 0xf3c   : > { %p2752_p8 = pnand %p2751_p7, %p2945_p10 }
 0xf3d   : > { %p2757_p11 = por %p2756_p13, %p2755_p12 }
 0xf3e   : > { %p2753_p9 = pneg %p2752_p8 }
 0xf40   : > { %p2758_p0 = pnand %p2757_p11, %p2753_p9 }
 0xf42   : > { %2761 = shalt.err (!%p2758_p0)
}
 0xf43   : > { %2504 = dma.vmem_to_hbm [thread:$0]  (%p2945_p10), %s2057_s22, 16, %s2054_s12, %s3356_s17   ;;  %v2323_v63 = vld [vmem:[%s3451_s7 + $0x7] ss:$0 sm:$0xff]  ;;  %vm1995_vm0 = vcmask 207872  }
 0xf44   : > { %s2228_s2 = sshll.u32 %s3342_s25, 2  ;;  %s2325_s14 = sshll.u32 %s2926_s21, 6 }
 0xf45   : > { %s403_s16 = scalar_lea.vmem [#allocation7], %s2228_s2  ;;  %s3400_s17 = scalar_lea.hbm %s3452_s8, %s2325_s14 }
 0xf46   : > { %s2030_s15 = sshll.u32 %s403_s16, 4  ;;  %s2009_s21 = scalar_lea.sflag [#allocation6], %s3342_s25  ;;  %s3402_s15 = int_to_ptr.vmem [resolvable:$true] %s2030_s15 }
 0xf47   : > { %s2762_s22 = scalar_lea.vmem %s3402_s15, 64  ;;  %s2846_s12 = smov [#allocation7]  }
 0xf48   : > { %p2763_p1 = scmp.ne.s32.totalorder %s3402_s15, %s2762_s22  ;;  %s2766_s24 = sshll.u32 %s2846_s12, 4  ;;  %s2767_s24 = int_to_ptr.vmem [resolvable:$false] %s2766_s24 }
 0xf49   : > { %s2768_s29 = scalar_lea.vmem %s2767_s24, 128  ;;  %p2769_p4 = scmp.lt.s32.totalorder %s3402_s15, %s2767_s24 }
 0xf4a   : > { %p2764_p2 = pnand %p2763_p1, %p2945_p10  ;;  %p2770_p5 = scmp.lt.s32.totalorder %s2768_s29, %s2762_s22 }
 0xf4c   : > { %p2765_p3 = pneg %p2764_p2  ;;  %p2771_p6 = por %p2770_p5, %p2769_p4 }
 0xf4e   : > { %p2772_p7 = pnand %p2771_p6, %p2765_p3 }
 0xfd6   : > { %v1928_v62 = vpop.f32.mrf.mxu0 }
 0xfd7   : > { %v1984_v27 = vadd.f32 %v3332_v38, %v1928_v62 }
 0xfd8   : > { %v2488_v50 = vpop.f32.mrf.mxu0 }
 0xfd9   : > { %v1994_v0 = vadd.f32 %v2323_v63, %v1984_v27 }
 0xfda   : > { %v1931_v1 = vpop.f32.mrf.mxu0 }
 0xfdb   : > { %1996 = vst.msk [vmem:[%s403_s16] sm:$0xf] %vm1995_vm0, %v1994_v0 }
 0xfdc   : > { %v2489_v2 = vpop.f32.mrf.mxu0 }
 0xfdd   : > { %2775 = shalt.err (!%p2772_p7)
}
 0xfde   : > { %s2776_s2 = scalar_lea.hbm %s3400_s17, 64  ;;  %s2780_s13 = scalar_lea.hbm %s3452_s8, 128 }
 0xfdf   : > { %p2777_p8 = scmp.ne.s32.totalorder %s3400_s17, %s2776_s2  ;;  %p2781_p13 = scmp.lt.s32.totalorder %s3400_s17, %s3452_s8 }
 0xfe0   : > { %p2782_p11 = scmp.lt.s32.totalorder %s2780_s13, %s2776_s2 }
 0xfe1   : > { %p2778_p9 = pnand %p2777_p8, %p2945_p10 }
 0xfe2   : > { %p2783_p0 = por %p2782_p11, %p2781_p13 }
 0xfe3   : > { %p2779_p12 = pneg %p2778_p9 }
 0xfe5   : > { %p2784_p1 = pnand %p2783_p0, %p2779_p12 }
 0xfe7   : > { %2787 = shalt.err (!%p2784_p1)
}
 0xfe8   : > { %2502 = dma.vmem_to_hbm [thread:$0]  (%p2945_p10), %s3402_s15, 64, %s3400_s17, %s2009_s21  }
 0xfe9 PF: > { %p2524_p2 = scmp.ge.s32.totalorder %s2832_s20, 2  ;;  %s2068_s1 = sand.u32 1, %s2820_s18  }
 0xfea   : > { %p3481_p3 = scmp.ne.s32.totalorder %s3461_s28, 0  ;;  %s2069_s30 = scalar_lea.sflag [#allocation6], %s2068_s1 }
 0xfec   : > { %p2513_p4 = pnand %p2524_p2, %p3481_p3 }
 0xfee   : > { %p2514_p5 = pneg %p2513_p4 }
 0xff0   : > { %2811 = dma.done.wait (%p2514_p5), %s2069_s30, 64  }
 0xff1   : > { %2813 = vsyncadd (%p2514_p5), %s2069_s30, 4294967232  ;;  %s3482_s22 = sadd.s32 4294967294, %s2832_s20  }
 0xff2   : > { %s2077_s12 = sand.u32 1, %s3482_s22  }
 0xff3   : > { %s2078_s24 = scalar_lea.sflag [#allocation9], %s2077_s12 }
 0xff4   : > { %2815 = dma.done.wait (%p2514_p5), %s2078_s24, 32  }
 0xff5   : > { %2817 = vsyncadd (%p2514_p5), %s2078_s24, 4294967264  ;;  %p31_p10 = scmp.ge.s32.totalorder %s2930_s23, 4   ;;  %s3483_s18 = smov %s2824_s0 }
 0xff6   : > { %s3484_s0 = smov %s2828_s19  ;;  %s3485_s19 = smov %s2943_s26 }
 0xff7   : > { %s3486_s20 = smov %s2930_s23  ;;  %33 = sbr.rel (!%p31_p10) target bundleno = 22 (0x16), region = 132 }
 0xffc   :  { %2090 = vsyncpa [#allocation5], 1 }
 0xffd   :  { %2092 = vsyncpa [#allocation5 + $0x1], 1 }
 0xffe   :  { %2093 = vsyncpa [#allocation6], 1 }
 0xfff   :  { %2095 = vsyncpa [#allocation6 + $0x1], 1 }
0x1000   :  { %2096 = vsyncpa [#allocation9], 1 }
0x1001   :  { %2098 = vsyncpa [#allocation9 + $0x1], 1 }

</bundles_post_ra>
